<compile_context>
chip_gen: v7x
topology: tpu7x:2x2x1
jax: 0.10.0
libtpu: 0.0.40
codegen_flags: <defaults>
</compile_context>

<pallas_src>
import functools

import jax
import jax.numpy as jnp
from jax.experimental import pallas as pl
from jax.experimental.pallas import tpu as pltpu

# Logical sizes (match the PyTorch NET).
D_IN, H1, H2, H3, D_OUT = 28 * 28, 512, 256, 64, 10
# Lane-padded sizes used inside the kernel (multiples of 128 on the lane axis).
H3_P, D_OUT_P = 128, 128  # 64 -> 128, 10 -> 128 (zero pad)


def mlp_kernel(x_ref, w1_ref, b1_ref, w2_ref, b2_ref, w3_ref, b3_ref,
               w4_ref, b4_ref, o_ref):
    cdt = w1_ref.dtype  # MXU input dtype (bf16); accumulation stays f32
    # Layer 1: (tb, 784) @ (784, 512) + (1, 512), ReLU.
    # x arrives f32 and is cast here (VPU work, hidden under MXU / DMA).
    h = jnp.dot(x_ref[...].astype(cdt), w1_ref[...],
                preferred_element_type=jnp.float32)
    h = jnp.maximum(h + b1_ref[...], 0.0)
    # Layer 2: (tb, 512) @ (512, 256) + (1, 256), ReLU
    h = jnp.dot(h.astype(cdt), w2_ref[...], preferred_element_type=jnp.float32)
    h = jnp.maximum(h + b2_ref[...], 0.0)
    # Layer 3: (tb, 256) @ (256, 128) + (1, 128), ReLU   (cols 64..127 zero pad)
    h = jnp.dot(h.astype(cdt), w3_ref[...], preferred_element_type=jnp.float32)
    h = jnp.maximum(h + b3_ref[...], 0.0)
    # Layer 4: (tb, 128) @ (128, 128) + (1, 128), ReLU   (cols 10..127 zero pad)
    h = jnp.dot(h.astype(cdt), w4_ref[...], preferred_element_type=jnp.float32)
    h = jnp.maximum(h + b4_ref[...], 0.0)
    o_ref[...] = h.astype(o_ref.dtype)


def prepare_params(params, compute_dtype=jnp.bfloat16):
    """One-time pad+cast of weights/biases.

    Call once and reuse the result across forwards; this keeps the per-call HBM
    traffic down to the x tiles + one resident weight fetch.
    """
    w1, b1, w2, b2, w3, b3, w4, b4 = params
    f32 = jnp.float32
    w3p = jnp.pad(w3, ((0, 0), (0, H3_P - H3)))
    b3p = jnp.pad(b3, ((0, 0), (0, H3_P - H3)))
    w4p = jnp.pad(w4, ((0, H3_P - H3), (0, D_OUT_P - D_OUT)))
    b4p = jnp.pad(b4, ((0, 0), (0, D_OUT_P - D_OUT)))
    return (w1.astype(compute_dtype), b1.astype(f32),
            w2.astype(compute_dtype), b2.astype(f32),
            w3p.astype(compute_dtype), b3p.astype(f32),
            w4p.astype(compute_dtype), b4p.astype(f32))


@functools.lru_cache(maxsize=None)
def _build_call(Bp, tb):
    """Build (and cache) the pallas_call for a given padded batch / tile size."""
    # Weights/biases: constant index_map (fetched once, reused every grid step)
    # and single-buffered so they sit resident in VMEM without a second buffer.
    resident = lambda shape: pl.BlockSpec(
        shape, lambda i: (0,) * len(shape), pipeline_mode=pl.Buffered(1))
    return pl.pallas_call(
        mlp_kernel,
        out_shape=jax.ShapeDtypeStruct((Bp, D_OUT_P), jnp.float32),
        grid_spec=pltpu.PrefetchScalarGridSpec(
            num_scalar_prefetch=0,
            grid=(Bp // tb,),
            in_specs=[
                pl.BlockSpec((tb, D_IN), lambda i: (i, 0)),   # x tile, f32, pipelined
                resident((D_IN, H1)), resident((1, H1)),
                resident((H1, H2)), resident((1, H2)),
                resident((H2, H3_P)), resident((1, H3_P)),
                resident((H3_P, D_OUT_P)), resident((1, D_OUT_P)),
            ],
            out_specs=pl.BlockSpec((tb, D_OUT_P), lambda i: (i, 0)),
        ),
        compiler_params=pltpu.CompilerParams(
            dimension_semantics=("parallel",),   # batch grid -> megacore/TC split
            vmem_limit_bytes=32 * 1024 * 1024,   # footprint is ~2 MiB; plenty of headroom
        ),
    )


def net_forward(x_nchw, prepared_params, *, tb=128):
    """x_nchw: (B, 1, 28, 28) float32; prepared_params from prepare_params().

    Returns float32 logits of shape (B, 10).
    """
    B = x_nchw.shape[0]
    x = x_nchw.reshape(B, D_IN)                    # nn.Flatten(): metadata-only reshape
    tb_eff = min(tb, max(8, -(-B // 8) * 8))       # shrink tile for tiny batches
    Bp = -(-B // tb_eff) * tb_eff
    if Bp != B:
        # Padded rows compute ReLU(bias) garbage; it is sliced off below.
        x = jnp.pad(x, ((0, Bp - B), (0, 0)))
    out = _build_call(Bp, tb_eff)(x, *prepared_params)
    return out[:B, :D_OUT]


def init_params(key):
    """Weights (in, out), biases (1, out); torch-like U(-1/sqrt(in), 1/sqrt(in))."""
    dims = [(D_IN, H1), (H1, H2), (H2, H3), (H3, D_OUT)]
    params = []
    for i, (din, dout) in enumerate(dims):
        kw, kb = jax.random.split(jax.random.fold_in(key, i))
        bound = 1.0 / jnp.sqrt(din)
        w = jax.random.uniform(kw, (din, dout), jnp.float32, -bound, bound)
        b = jax.random.uniform(kb, (1, dout), jnp.float32, -bound, bound)
        params += [w, b]
    return tuple(params)


def reference_forward(x_nchw, params, compute_dtype=jnp.bfloat16):
    """Pure-JAX reference mirroring the kernel numerics (bf16 matmul inputs, f32 accum)."""
    # TODO(synk): kernel matmul inputs are bf16 (f32 accumulation); pass
    # compute_dtype=jnp.float32 to prepare_params/here for exact torch-f32 parity.
    w1, b1, w2, b2, w3, b3, w4, b4 = params
    h = x_nchw.reshape(x_nchw.shape[0], -1)
    for w, b in ((w1, b1), (w2, b2), (w3, b3), (w4, b4)):
        h = jnp.dot(h.astype(compute_dtype), w.astype(compute_dtype),
                    preferred_element_type=jnp.float32)
        h = jnp.maximum(h + b.astype(jnp.float32), 0.0)
    return h


if __name__ == "__main__":
    key = jax.random.PRNGKey(0)
    kx, kp = jax.random.split(key)
    # B=512 with tb=128 -> grid of 4 steps: >=2 pipelined steps per TensorCore on
    # v7x, MXU-shaped M=128 tiles everywhere, and weight fetch amortized over 4 tiles.
    B, tb = 512, 128
    x = jax.random.normal(kx, (B, 1, 28, 28), jnp.float32)  # NCHW, MNIST-like
    params = init_params(kp)

    # One-time weight preparation (pad + bf16 cast) — reused across all forwards.
    prepared = jax.block_until_ready(prepare_params(params))

    out = jax.block_until_ready(net_forward(x, prepared, tb=tb))
    ref = reference_forward(x, params)

    assert out.shape == (B, D_OUT)
    # Same bf16-input / f32-accumulation numerics in kernel and reference; only
    # accumulation-order / rounding-boundary differences remain.
    assert jnp.allclose(out, ref, atol=2e-2, rtol=2e-2), float(jnp.max(jnp.abs(out - ref)))
    print("KERNEL_OK")
</pallas_src>

<mosaic_0001>
module attributes {stable_mosaic.version = 11 : i64} {
  func.func @mlp_kernel(%arg0: i32, %arg1: memref<128x784xf32, #tpu.memory_space<vmem>>, %arg2: memref<784x512xbf16, #tpu.memory_space<vmem>>, %arg3: memref<1x512xf32, #tpu.memory_space<vmem>>, %arg4: memref<512x256xbf16, #tpu.memory_space<vmem>>, %arg5: memref<1x256xf32, #tpu.memory_space<vmem>>, %arg6: memref<256x128xbf16, #tpu.memory_space<vmem>>, %arg7: memref<1x128xf32, #tpu.memory_space<vmem>>, %arg8: memref<128x128xbf16, #tpu.memory_space<vmem>>, %arg9: memref<1x128xf32, #tpu.memory_space<vmem>>, %arg10: memref<128x128xf32, #tpu.memory_space<vmem>>) attributes {dimension_semantics = [#tpu.dimension_semantics<parallel>], iteration_bounds = array<i64: 4>, scalar_prefetch = 0 : i64, scratch_operands = 0 : i64, tpu.core_type = #tpu.core_type<tc>, window_params = [{transform_indices = @transform_0, window_bounds = array<i64: 128, 784>}, {pipeline_mode = #tpu.pipeline_mode<synchronous>, transform_indices = @transform_1, window_bounds = array<i64: 784, 512>}, {pipeline_mode = #tpu.pipeline_mode<synchronous>, transform_indices = @transform_2, window_bounds = array<i64: 1, 512>}, {pipeline_mode = #tpu.pipeline_mode<synchronous>, transform_indices = @transform_3, window_bounds = array<i64: 512, 256>}, {pipeline_mode = #tpu.pipeline_mode<synchronous>, transform_indices = @transform_4, window_bounds = array<i64: 1, 256>}, {pipeline_mode = #tpu.pipeline_mode<synchronous>, transform_indices = @transform_5, window_bounds = array<i64: 256, 128>}, {pipeline_mode = #tpu.pipeline_mode<synchronous>, transform_indices = @transform_6, window_bounds = array<i64: 1, 128>}, {pipeline_mode = #tpu.pipeline_mode<synchronous>, transform_indices = @transform_7, window_bounds = array<i64: 128, 128>}, {pipeline_mode = #tpu.pipeline_mode<synchronous>, transform_indices = @transform_8, window_bounds = array<i64: 1, 128>}, {transform_indices = @transform_9, window_bounds = array<i64: 128, 128>}]} {
    %c0 = arith.constant 0 : index
    %c0_0 = arith.constant 0 : index
    %0 = vector.load %arg1[%c0, %c0_0] : memref<128x784xf32, #tpu.memory_space<vmem>>, vector<128x784xf32>
    %1 = arith.truncf %0 : vector<128x784xf32> to vector<128x784xbf16>
    %c0_1 = arith.constant 0 : index
    %c0_2 = arith.constant 0 : index
    %2 = vector.load %arg2[%c0_1, %c0_2] : memref<784x512xbf16, #tpu.memory_space<vmem>>, vector<784x512xbf16>
    %cst = arith.constant dense<0.000000e+00> : vector<128x512xf32>
    %3 = tpu.matmul %1, %2, %cst {dimension_numbers = #tpu.dot_dimension_numbers<[1], [0], [0], [1], [0, 0, 1, 1], [], []>} : vector<128x784xbf16>, vector<784x512xbf16>, vector<128x512xf32> -> vector<128x512xf32>
    %c0_3 = arith.constant 0 : index
    %c0_4 = arith.constant 0 : index
    %4 = vector.load %arg3[%c0_3, %c0_4] : memref<1x512xf32, #tpu.memory_space<vmem>>, vector<1x512xf32>
    %5 = vector.broadcast %4 : vector<1x512xf32> to vector<128x512xf32>
    %6 = arith.addf %3, %5 : vector<128x512xf32>
    %cst_5 = arith.constant 0.000000e+00 : f32
    %7 = vector.broadcast %cst_5 : f32 to vector<128x512xf32>
    %8 = arith.maximumf %6, %7 : vector<128x512xf32>
    %9 = arith.truncf %8 : vector<128x512xf32> to vector<128x512xbf16>
    %c0_6 = arith.constant 0 : index
    %c0_7 = arith.constant 0 : index
    %10 = vector.load %arg4[%c0_6, %c0_7] : memref<512x256xbf16, #tpu.memory_space<vmem>>, vector<512x256xbf16>
    %cst_8 = arith.constant dense<0.000000e+00> : vector<128x256xf32>
    %11 = tpu.matmul %9, %10, %cst_8 {dimension_numbers = #tpu.dot_dimension_numbers<[1], [0], [0], [1], [0, 0, 1, 1], [], []>} : vector<128x512xbf16>, vector<512x256xbf16>, vector<128x256xf32> -> vector<128x256xf32>
    %c0_9 = arith.constant 0 : index
    %c0_10 = arith.constant 0 : index
    %12 = vector.load %arg5[%c0_9, %c0_10] : memref<1x256xf32, #tpu.memory_space<vmem>>, vector<1x256xf32>
    %13 = vector.broadcast %12 : vector<1x256xf32> to vector<128x256xf32>
    %14 = arith.addf %11, %13 : vector<128x256xf32>
    %cst_11 = arith.constant 0.000000e+00 : f32
    %15 = vector.broadcast %cst_11 : f32 to vector<128x256xf32>
    %16 = arith.maximumf %14, %15 : vector<128x256xf32>
    %17 = arith.truncf %16 : vector<128x256xf32> to vector<128x256xbf16>
    %c0_12 = arith.constant 0 : index
    %c0_13 = arith.constant 0 : index
    %18 = vector.load %arg6[%c0_12, %c0_13] : memref<256x128xbf16, #tpu.memory_space<vmem>>, vector<256x128xbf16>
    %cst_14 = arith.constant dense<0.000000e+00> : vector<128x128xf32>
    %19 = tpu.matmul %17, %18, %cst_14 {dimension_numbers = #tpu.dot_dimension_numbers<[1], [0], [0], [1], [0, 0, 1, 1], [], []>} : vector<128x256xbf16>, vector<256x128xbf16>, vector<128x128xf32> -> vector<128x128xf32>
    %c0_15 = arith.constant 0 : index
    %c0_16 = arith.constant 0 : index
    %20 = vector.load %arg7[%c0_15, %c0_16] : memref<1x128xf32, #tpu.memory_space<vmem>>, vector<1x128xf32>
    %21 = vector.broadcast %20 : vector<1x128xf32> to vector<128x128xf32>
    %22 = arith.addf %19, %21 : vector<128x128xf32>
    %cst_17 = arith.constant 0.000000e+00 : f32
    %23 = vector.broadcast %cst_17 : f32 to vector<128x128xf32>
    %24 = arith.maximumf %22, %23 : vector<128x128xf32>
    %25 = arith.truncf %24 : vector<128x128xf32> to vector<128x128xbf16>
    %c0_18 = arith.constant 0 : index
    %c0_19 = arith.constant 0 : index
    %26 = vector.load %arg8[%c0_18, %c0_19] : memref<128x128xbf16, #tpu.memory_space<vmem>>, vector<128x128xbf16>
    %cst_20 = arith.constant dense<0.000000e+00> : vector<128x128xf32>
    %27 = tpu.matmul %25, %26, %cst_20 {dimension_numbers = #tpu.dot_dimension_numbers<[1], [0], [0], [1], [0, 0, 1, 1], [], []>} : vector<128x128xbf16>, vector<128x128xbf16>, vector<128x128xf32> -> vector<128x128xf32>
    %c0_21 = arith.constant 0 : index
    %c0_22 = arith.constant 0 : index
    %28 = vector.load %arg9[%c0_21, %c0_22] : memref<1x128xf32, #tpu.memory_space<vmem>>, vector<1x128xf32>
    %29 = vector.broadcast %28 : vector<1x128xf32> to vector<128x128xf32>
    %30 = arith.addf %27, %29 : vector<128x128xf32>
    %cst_23 = arith.constant 0.000000e+00 : f32
    %31 = vector.broadcast %cst_23 : f32 to vector<128x128xf32>
    %32 = arith.maximumf %30, %31 : vector<128x128xf32>
    %c0_24 = arith.constant 0 : index
    %c0_25 = arith.constant 0 : index
    %33 = vector.load %arg10[%c0_24, %c0_25] : memref<128x128xf32, #tpu.memory_space<vmem>>, vector<128x128xf32>
    tpu.vector_store %arg10[%c0_24, %c0_25], %32 {strides = array<i32>} : memref<128x128xf32, #tpu.memory_space<vmem>>, vector<128x128xf32>,
    return
  }
  func.func @transform_0(%arg0: i32) -> (i32, i32) {
    %c0_i32 = arith.constant 0 : i32
    %c0_i32_0 = arith.constant 0 : i32
    return %arg0, %c0_i32 : i32, i32
  }
  func.func @transform_1(%arg0: i32) -> (i32, i32) {
    %c0_i32 = arith.constant 0 : i32
    %c0_i32_0 = arith.constant 0 : i32
    %c0_i32_1 = arith.constant 0 : i32
    return %c0_i32, %c0_i32_0 : i32, i32
  }
  func.func @transform_2(%arg0: i32) -> (i32, i32) {
    %c0_i32 = arith.constant 0 : i32
    %c0_i32_0 = arith.constant 0 : i32
    %c0_i32_1 = arith.constant 0 : i32
    return %c0_i32, %c0_i32_0 : i32, i32
  }
  func.func @transform_3(%arg0: i32) -> (i32, i32) {
    %c0_i32 = arith.constant 0 : i32
    %c0_i32_0 = arith.constant 0 : i32
    %c0_i32_1 = arith.constant 0 : i32
    return %c0_i32, %c0_i32_0 : i32, i32
  }
  func.func @transform_4(%arg0: i32) -> (i32, i32) {
    %c0_i32 = arith.constant 0 : i32
    %c0_i32_0 = arith.constant 0 : i32
    %c0_i32_1 = arith.constant 0 : i32
    return %c0_i32, %c0_i32_0 : i32, i32
  }
  func.func @transform_5(%arg0: i32) -> (i32, i32) {
    %c0_i32 = arith.constant 0 : i32
    %c0_i32_0 = arith.constant 0 : i32
    %c0_i32_1 = arith.constant 0 : i32
    return %c0_i32, %c0_i32_0 : i32, i32
  }
  func.func @transform_6(%arg0: i32) -> (i32, i32) {
    %c0_i32 = arith.constant 0 : i32
    %c0_i32_0 = arith.constant 0 : i32
    %c0_i32_1 = arith.constant 0 : i32
    return %c0_i32, %c0_i32_0 : i32, i32
  }
  func.func @transform_7(%arg0: i32) -> (i32, i32) {
    %c0_i32 = arith.constant 0 : i32
    %c0_i32_0 = arith.constant 0 : i32
    %c0_i32_1 = arith.constant 0 : i32
    return %c0_i32, %c0_i32_0 : i32, i32
  }
  func.func @transform_8(%arg0: i32) -> (i32, i32) {
    %c0_i32 = arith.constant 0 : i32
    %c0_i32_0 = arith.constant 0 : i32
    %c0_i32_1 = arith.constant 0 : i32
    return %c0_i32, %c0_i32_0 : i32, i32
  }
  func.func @transform_9(%arg0: i32) -> (i32, i32) {
    %c0_i32 = arith.constant 0 : i32
    %c0_i32_0 = arith.constant 0 : i32
    return %arg0, %c0_i32 : i32, i32
  }
}

</mosaic_0001>

<bundles_post_ra>
// kernel: tpu_custom_call.1
= control target key start
LH: loop header
LB: loop body
LE: loop exit
PB: predicated region body
PF: predicated region fallthrough
CT: control target
= control target key end

     0   :  { %14 = vsyncpa [#allocation3], 0  ;;  %s6726_s0 = inlined_call_operand.vmem [shape: f32[512,784], index: 0, kind: input, shape index: {}]   ;;  %s6727_s1 = inlined_call_operand.vmem [shape: bf16[784,512], index: 1, kind: input, shape index: {}]   ;;  %s6728_s2 = inlined_call_operand.vmem [shape: f32[1,512], index: 2, kind: input, shape index: {}]   ;;  %s6729_s3 = inlined_call_operand.vmem [shape: bf16[512,256], index: 3, kind: input, shape index: {}]   ;;  %s6730_s4 = inlined_call_operand.vmem [shape: f32[1,256], index: 4, kind: input, shape index: {}]   ;;  %s6731_s5 = inlined_call_operand.vmem [shape: bf16[256,128], index: 5, kind: input, shape index: {}]   ;;  %s6732_s6 = inlined_call_operand.vmem [shape: f32[1,128], index: 6, kind: input, shape index: {}]   ;;  %s6733_s7 = inlined_call_operand.vmem [shape: bf16[128,128], index: 7, kind: input, shape index: {}]   ;;  %s6734_s8 = inlined_call_operand.vmem [shape: f32[1,128], index: 8, kind: input, shape index: {}]   ;;  %s6735_s9 = inlined_call_operand.hbm [shape: f32[512,128], index: 9, kind: output, shape index: {}]  }
   0x1   :  { %16 = vsyncpa [#allocation3 + $0x1], 0  ;;  %s5269_s30 = smov 0   ;;  %s5271_s10 = smov 0  }
   0x2   :  { %s5273_s11 = smov 0   ;;  %s5275_s12 = smov 0  }
   0x3 LB: > { %s5290_s13 = sadd.s32 4294967295, %s5213_s12   ;;  %s3931_s14 = sadd.s32 4294967294, %s5213_s12   ;;  %s5213_s12 = sphi %s5275_s12, %s6741_s12   ;;  %s5209_s11 = sphi %s5273_s11, %s6740_s11   ;;  %s5205_s10 = sphi %s5271_s10, %s6739_s10   ;;  %s5201_s30 = sphi %s5269_s30, %s6738_s30  }
   0x4   : > { %s5294_s15 = sadd.s32 1, %s5213_s12   ;;  %s223_s16 = sadd.s32 1, %s5209_s11 }
   0x5   : > { %s220_s17 = ssub.s32 %s5213_s12, %s5294_s15  ;;  %p233_p0 = scmp.ne.s32.totalorder %s5209_s11, %s5205_s10 }
   0x6   : > { %p221_p1 = scmp.eq.s32.totalorder %s220_s17, 0  ;;  %p234_p2 = scmp.eq.s32.totalorder %s5290_s13, 3 }
   0x7   : > { %p239_p3 = scmp.ne.s32.totalorder %s5205_s10, %s5201_s30  ;;  %p240_p4 = scmp.eq.s32.totalorder %s3931_s14, 3 }
   0x8   : > { %s5305_s18 = scalar_select %p221_p1, %s5209_s11, %s223_s16  }
   0x9   : > { %p5307_p5 = por %p234_p2, %p233_p0  ;;  %p5311_p6 = por %p240_p4, %p239_p3 }
   0xa   : > { %p3934_p7 = scmp.ge.s32.totalorder %s5213_s12, 1  ;;  %p292_p8 = scmp.lt.s32.totalorder %s5213_s12, 5 }
   0xc   : > { %p293_p9 = pnand %p3934_p7, %p292_p8 }
   0xd   : > { %v4737_v0 = vld [vmem:[%s6727_s1 + $0x4] ss:$16 sps:$4 sm:$0xff] (!%p293_p9)   ;;  %s3936_s23 = sshll.u32 (!%p293_p9), %s5290_s13, 4  ;;  %v4739_v1 = vld [vmem:[%s6727_s1] ss:$16 sps:$4 sm:$0xff] (!%p293_p9)   ;;  %v5215_v2 = vmov (!%p293_p9), 0  }
   0xe   : > { %296 = sbr.rel (%p293_p9) target bundleno = 1241 (0x4d9), region = 56  ;;  %2100 = vmatprep.mubr.bf16.mxu1 (!%p293_p9), %v5215_v2  ;;  %p330_p10 = scmp.lt.s32.totalorder (!%p293_p9), %s3936_s23, 63  ;;  %1729 = vmatprep.subr.bf16.mxu0 (!%p293_p9), %v4737_v0  ;;  %v4740_v3 = vld [vmem:[%s6727_s1 + $0x604] ss:$16 sps:$4 sm:$0xff] (!%p293_p9)   ;;  %v4744_v5 = vld [vmem:[%s6727_s1 + $0x600] ss:$16 sps:$4 sm:$0xff] (!%p293_p9)  }
   0xf   : > { %1730 = vmatpush1.bf16.msra.mxu0 (!%p293_p9), %v4739_v1  ;;  %v4742_v4 = vld [vmem:[%s6727_s1 + $0x24] ss:$16 sps:$4 sm:$0xff] (!%p293_p9)   ;;  %v4745_v6 = vld [vmem:[%s6727_s1 + $0x20] ss:$16 sps:$4 sm:$0xff] (!%p293_p9)   ;;  %2068 = vmatprep.subr.bf16.mxu1 (!%p293_p9), %v4740_v3  ;;  %v4748_v7 = vld [vmem:[%s6727_s1 + $0xc] ss:$16 sps:$4 sm:$0xff] (!%p293_p9)  }
  0x10   : > { %1731 = vmatprep.subr.bf16.mxu0 (!%p293_p9), %v4742_v4  ;;  %2069 = vmatpush1.bf16.msra.mxu1 (!%p293_p9), %v4744_v5  ;;  %v4749_v8 = vld [vmem:[%s6727_s1 + $0x44] ss:$16 sps:$4 sm:$0xff] (!%p293_p9)   ;;  %v4751_v9 = vld [vmem:[%s6727_s1 + $0x40] ss:$16 sps:$4 sm:$0xff] (!%p293_p9)   ;;  %v4746_v11 = vld [vmem:[%s6727_s1 + $0x8] ss:$16 sps:$4 sm:$0xff] (!%p293_p9)  }
  0x11   : > { %2181 = vmatprep.subr.bf16.mxu1 (!%p293_p9), %v4748_v7  ;;  %v4755_v10 = vld [vmem:[%s6727_s1 + $0x64] ss:$16 sps:$4 sm:$0xff] (!%p293_p9)   ;;  %vm1704_vm0 = vcmask (!%p293_p9), 130048   ;;  %v4754_v15 = vld [vmem:[%s6727_s1 + $0x2c] ss:$16 sps:$4 sm:$0xff] (!%p293_p9)   ;;  %s4245_s16 = sshll.u32 (!%p293_p9), %s5290_s13, 11 }
  0x12   : > { %v4757_v16 = vld [vmem:[%s6727_s1 + $0x60] ss:$16 sps:$4 sm:$0xff] (!%p293_p9)   ;;  %v4752_v17 = vld [vmem:[%s6727_s1 + $0x28] ss:$16 sps:$4 sm:$0xff] (!%p293_p9)   ;;  %v4761_v18 = vld [vmem:[%s6727_s1 + $0x84] ss:$16 sps:$4 sm:$0xff] (!%p293_p9)   ;;  %s6676_s24 = scalar_lea.hbm (!%p293_p9), %s6735_s9, %s4245_s16 }
  0x13   : > { %1732 = vmatpush1.bf16.msra.mxu0 (!%p293_p9), %v4745_v6  ;;  %v4760_v21 = vld [vmem:[%s6727_s1 + $0x4c] ss:$16 sps:$4 sm:$0xff] (!%p293_p9)   ;;  %v4763_v22 = vld [vmem:[%s6727_s1 + $0x80] ss:$16 sps:$4 sm:$0xff] (!%p293_p9)   ;;  %v4767_v24 = vld [vmem:[%s6727_s1 + $0xa4] ss:$16 sps:$4 sm:$0xff] (!%p293_p9)  }
  0x14   : > { %1733 = vmatprep.subr.bf16.mxu0 (!%p293_p9), %v4749_v8  ;;  %v4758_v25 = vld [vmem:[%s6727_s1 + $0x48] ss:$16 sps:$4 sm:$0xff] (!%p293_p9)   ;;  %v4766_v26 = vld [vmem:[%s6727_s1 + $0x6c] ss:$16 sps:$4 sm:$0xff] (!%p293_p9)   ;;  %v4769_v27 = vld [vmem:[%s6727_s1 + $0xa0] ss:$16 sps:$4 sm:$0xff] (!%p293_p9)  }
  0x15   : > { %s6743_s23 = smov (!%p330_p10, %s3936_s23), 63  ;;  %v4764_v28 = vld [vmem:[%s6727_s1 + $0x68] ss:$16 sps:$4 sm:$0xff]   ;;  %v4773_v29 = vld [vmem:[%s6727_s1 + $0xc4] ss:$16 sps:$4 sm:$0xff]   ;;  %s5216_s26 = smov [#allocation2]  }
  0x16   : > { %s4694_s27 = smul.u32 56, %s6743_s23  ;;  %v4772_v32 = vld [vmem:[%s6727_s1 + $0x8c] ss:$16 sps:$4 sm:$0xff]   ;;  %v4775_v33 = vld [vmem:[%s6727_s1 + $0xc0] ss:$16 sps:$4 sm:$0xff]   ;;  %s5155_s28 = sshll.u32 %s5216_s26, 4  ;;  %s5156_s28 = int_to_ptr.vmem [resolvable:$false] %s5155_s28 }
  0x17   : > { %1734 = vmatpush1.bf16.msra.mxu0 %v4751_v9  ;;  %v4779_v35 = vld [vmem:[%s6727_s1 + $0xe4] ss:$16 sps:$4 sm:$0xff]   ;;  %v4770_v36 = vld [vmem:[%s6727_s1 + $0x88] ss:$16 sps:$4 sm:$0xff]   ;;  %v4778_v37 = vld [vmem:[%s6727_s1 + $0xac] ss:$16 sps:$4 sm:$0xff]  }
  0x18   : > { %s5349_s17 = scalar_lea.vmem %s6726_s0, %s4694_s27  ;;  %1735 = vmatprep.subr.bf16.mxu0 %v4755_v10  ;;  %v4776_v38 = vld [vmem:[%s6727_s1 + $0xa8] ss:$16 sps:$4 sm:$0xff]   ;;  %v4781_v39 = vld [vmem:[%s6727_s1 + $0xe0] ss:$16 sps:$4 sm:$0xff]   ;;  %v4785_v40 = vld [vmem:[%s6727_s1 + $0x104] ss:$16 sps:$4 sm:$0xff]  }
  0x19   : > { %v344_v12 = vld [vmem:[%s5349_s17 + $0x30] sm:$0xff]  ;;  %v351_v13 = vld [vmem:[%s5349_s17 + $0x68] sm:$0xff]  ;;  %v358_v19 = vld [vmem:[%s5349_s17 + $0xa0] sm:$0xff]  ;;  %s326_s27 = sand.u32 1, %s5205_s10  }
  0x1a   : > { %v5359_v14 = vpack.c.bf16 %v351_v13, %v344_v12  ;;  %v365_v20 = vld [vmem:[%s5349_s17 + $0xd8] sm:$0xff]  ;;  %v372_v30 = vld [vmem:[%s5349_s17 + $0x110] sm:$0xff]  ;;  %v379_v31 = vld [vmem:[%s5349_s17 + $0x148] sm:$0xff]  ;;  %s3935_s29 = sshll.u32 %s326_s27, 7  ;;  %s6685_s13 = scalar_lea.sflag [#allocation3], %s326_s27 }
  0x1b   : > { %1736 = vmatpush1.bf16.msra.mxu0 %v4757_v16  ;;  %v5384_v23 = vpack.c.bf16 %v365_v20, %v358_v19  ;;  %v5415_v34 = vpack.c.bf16 %v379_v31, %v372_v30  ;;  %v386_v41 = vld [vmem:[%s5349_s17 + $0x180] sm:$0xff]  ;;  %v393_v42 = vld [vmem:[%s5349_s17 + $0x1b8] sm:$0xff]  ;;  %v400_v52 = vld [vmem:[%s5349_s17 + $0x1f0] sm:$0xff]  ;;  %s6656_s14 = scalar_lea.vmem [#allocation2], %s3935_s29 }
  0x1c   : > { %4134 = vmatmul.mubr.msk.bf16.vlgmr.msra.gmra.mrb[0].mxu1 %vm1704_vm0, %v5359_v14  ;;  %1737 = vmatprep.subr.bf16.mxu0 %v4761_v18  ;;  %v4784_v43 = vld [vmem:[%s6727_s1 + $0xcc] ss:$16 sps:$4 sm:$0xff]   ;;  %v4787_v44 = vld [vmem:[%s6727_s1 + $0x100] ss:$16 sps:$4 sm:$0xff]   ;;  %v5446_v45 = vpack.c.bf16 %v393_v42, %v386_v41  ;;  %v4791_v46 = vld [vmem:[%s6727_s1 + $0x124] ss:$16 sps:$4 sm:$0xff]  }
  0x1d   : > { %2182 = vmatpush1.bf16.msra.mxu1 %v4746_v11  ;;  %2110 = vmatprep.mubr.bf16.mxu1 %v5215_v2  ;;  %v4782_v47 = vld [vmem:[%s6727_s1 + $0xc8] ss:$16 sps:$4 sm:$0xff]   ;;  %v4790_v48 = vld [vmem:[%s6727_s1 + $0xec] ss:$16 sps:$4 sm:$0xff]   ;;  %v4793_v49 = vld [vmem:[%s6727_s1 + $0x120] ss:$16 sps:$4 sm:$0xff]  }
  0x1e   : > { %2183 = vmatprep.subr.bf16.mxu1 %v4754_v15  ;;  %v4788_v50 = vld [vmem:[%s6727_s1 + $0xe8] ss:$16 sps:$4 sm:$0xff]   ;;  %v4797_v51 = vld [vmem:[%s6727_s1 + $0x144] ss:$16 sps:$4 sm:$0xff]   ;;  %v4796_v54 = vld [vmem:[%s6727_s1 + $0x10c] ss:$16 sps:$4 sm:$0xff]  }
  0x1f   : > { %1738 = vmatpush1.bf16.msra.mxu0 %v4763_v22  ;;  %v407_v53 = vld [vmem:[%s5349_s17 + $0x228] sm:$0xff]  ;;  %v4799_v55 = vld [vmem:[%s6727_s1 + $0x140] ss:$16 sps:$4 sm:$0xff]   ;;  %v4803_v57 = vld [vmem:[%s6727_s1 + $0x164] ss:$16 sps:$4 sm:$0xff]   ;;  %s3869_s21 = sshll.u32 %s6656_s14, 4  ;;  %s6678_s21 = int_to_ptr.vmem [resolvable:$true] %s3869_s21 }
  0x20   : > { %1739 = vmatprep.subr.bf16.mxu0 %v4767_v24  ;;  %v5477_v56 = vpack.c.bf16 %v407_v53, %v400_v52  ;;  %v4794_v58 = vld [vmem:[%s6727_s1 + $0x108] ss:$16 sps:$4 sm:$0xff]   ;;  %v4802_v59 = vld [vmem:[%s6727_s1 + $0x12c] ss:$16 sps:$4 sm:$0xff]   ;;  %v4805_v61 = vld [vmem:[%s6727_s1 + $0x160] ss:$16 sps:$4 sm:$0xff]   ;;  %p5158_p0 = scmp.lt.s32.totalorder %s6678_s21, %s5156_s28 }
  0x21   : > { %2184 = vmatpush1.bf16.msra.mxu1 %v4752_v17  ;;  %v4800_v60 = vld [vmem:[%s6727_s1 + $0x128] ss:$16 sps:$4 sm:$0xff]   ;;  %v4808_v62 = vld [vmem:[%s6727_s1 + $0x14c] ss:$16 sps:$4 sm:$0xff]   ;;  %v4809_v63 = vld [vmem:[%s6727_s1 + $0x184] ss:$16 sps:$4 sm:$0xff]  }
  0x22   : > { %2185 = vmatprep.subr.bf16.mxu1 %v4760_v21  ;;  %v414_v0 = vld [vmem:[%s5349_s17 + $0x260] sm:$0xff]  ;;  %v421_v1 = vld [vmem:[%s5349_s17 + $0x298] sm:$0xff]  ;;  %v339_v3 = vld [vmem:[%s5349_s17 + $0x8] sm:$0xff]  ;;  %s5151_s25 = scalar_lea.vmem %s6678_s21, 2048 }
  0x23   : > { %1740 = vmatpush1.bf16.msra.mxu0 %v4769_v27  ;;  %v346_v4 = vld [vmem:[%s5349_s17 + $0x40] sm:$0xff]  ;;  %v5512_v7 = vpack.c.bf16 %v421_v1, %v414_v0  ;;  %v4806_v9 = vld [vmem:[%s6727_s1 + $0x148] ss:$16 sps:$4 sm:$0xff]   ;;  %v4814_v10 = vld [vmem:[%s6727_s1 + $0x16c] ss:$16 sps:$4 sm:$0xff]   ;;  %p5152_p11 = scmp.ne.s32.totalorder %s6678_s21, %s5151_s25 }
  0x24   : > { %4135 = vmatmul.mubr.msk.bf16.gmra.mrb[4].mxu1 %vm1704_vm0, %v5384_v23  ;;  %1741 = vmatprep.subr.bf16.mxu0 %v4773_v29  ;;  %v4811_v5 = vld [vmem:[%s6727_s1 + $0x180] ss:$16 sps:$4 sm:$0xff]   ;;  %v5510_v6 = vpack.c.bf16 %v346_v4, %v339_v3  ;;  %v4815_v8 = vld [vmem:[%s6727_s1 + $0x1a4] ss:$16 sps:$4 sm:$0xff]   ;;  %v4812_v13 = vld [vmem:[%s6727_s1 + $0x168] ss:$16 sps:$4 sm:$0xff]  }
  0x25   : > { %2186 = vmatpush1.bf16.msra.mxu1 %v4758_v25  ;;  %2120 = vmatprep.mubr.bf16.mxu1 %v5215_v2  ;;  %v4817_v11 = vld [vmem:[%s6727_s1 + $0x1a0] ss:$16 sps:$4 sm:$0xff]   ;;  %v4821_v12 = vld [vmem:[%s6727_s1 + $0x1c4] ss:$16 sps:$4 sm:$0xff]   ;;  %v435_v16 = vld [vmem:[%s5349_s17 + $0x308] sm:$0xff]  ;;  %p5153_p12 = pnand %p5152_p11, %p5307_p5 }
  0x26   : > { %2187 = vmatprep.subr.bf16.mxu1 %v4766_v26  ;;  %1761 = vmatprep.mubr.bf16.mxu0 %v5510_v6  ;;  %v428_v15 = vld [vmem:[%s5349_s17 + $0x2d0] sm:$0xff]  ;;  %v4820_v17 = vld [vmem:[%s6727_s1 + $0x18c] ss:$16 sps:$4 sm:$0xff]   ;;  %v4818_v18 = vld [vmem:[%s6727_s1 + $0x188] ss:$16 sps:$4 sm:$0xff]  }
  0x27   : > { %1742 = vmatpush1.bf16.msra.mxu0 %v4775_v33  ;;  %v4823_v19 = vld [vmem:[%s6727_s1 + $0x1c0] ss:$16 sps:$4 sm:$0xff]   ;;  %v5547_v20 = vpack.c.bf16 %v435_v16, %v428_v15  ;;  %v4827_v21 = vld [vmem:[%s6727_s1 + $0x1e4] ss:$16 sps:$4 sm:$0xff]   ;;  %v4826_v22 = vld [vmem:[%s6727_s1 + $0x1ac] ss:$16 sps:$4 sm:$0xff]   ;;  %p5154_p13 = pneg %p5153_p12 }
  0x28   : > { %1743 = vmatprep.subr.bf16.mxu0 %v4779_v35  ;;  %v4829_v24 = vld [vmem:[%s6727_s1 + $0x1e0] ss:$16 sps:$4 sm:$0xff]   ;;  %v4824_v26 = vld [vmem:[%s6727_s1 + $0x1a8] ss:$16 sps:$4 sm:$0xff]   ;;  %v4832_v33 = vld [vmem:[%s6727_s1 + $0x1cc] ss:$16 sps:$4 sm:$0xff]  }
  0x29   : > { %2188 = vmatpush1.bf16.msra.mxu1 %v4764_v28  ;;  %v338_v25 = vld [vmem:[%s5349_s17] sm:$0xff]  ;;  %v345_v27 = vld [vmem:[%s5349_s17 + $0x38] sm:$0xff]  ;;  %v360_v30 = vld [vmem:[%s5349_s17 + $0xb0] sm:$0xff] }
  0x2a   : > { %2189 = vmatprep.subr.bf16.mxu1 %v4772_v32  ;;  %v4835_v28 = vld [vmem:[%s6727_s1 + $0x204] ss:$16 sps:$4 sm:$0xff]   ;;  %v353_v29 = vld [vmem:[%s5349_s17 + $0x78] sm:$0xff]  ;;  %v450_v35 = vpack.c.bf16 %v345_v27, %v338_v25  ;;  %v4839_v42 = vld [vmem:[%s6727_s1 + $0x220] ss:$16 sps:$4 sm:$0xff]  }
  0x2b   : > { %1744 = vmatpush1.bf16.msra.mxu0 %v4781_v39  ;;  %v442_v31 = vld [vmem:[%s5349_s17 + $0x340] sm:$0xff]  ;;  %v449_v32 = vld [vmem:[%s5349_s17 + $0x378] sm:$0xff]  ;;  %v395_v15 = vld [vmem:[%s5349_s17 + $0x1c8] sm:$0xff] }
  0x2c   : > { %4136 = vmatmul.mubr.msk.bf16.gmra.mrb[8].mxu1 %vm1704_vm0, %v5415_v34  ;;  %1745 = vmatprep.subr.bf16.mxu0 %v4785_v40  ;;  %v4841_v39 = vld [vmem:[%s6727_s1 + $0x224] ss:$16 sps:$4 sm:$0xff]   ;;  %v4830_v40 = vld [vmem:[%s6727_s1 + $0x1c8] ss:$16 sps:$4 sm:$0xff]   ;;  %v4838_v41 = vld [vmem:[%s6727_s1 + $0x1ec] ss:$16 sps:$4 sm:$0xff]  }
  0x2d   : > { %2190 = vmatpush1.bf16.msra.mxu1 %v4770_v36  ;;  %2130 = vmatprep.mubr.bf16.mxu1 %v5215_v2  ;;  %v4833_v36 = vld [vmem:[%s6727_s1 + $0x200] ss:$16 sps:$4 sm:$0xff]   ;;  %v4848_v0 = vld [vmem:[%s6727_s1 + $0x228] ss:$16 sps:$4 sm:$0xff]   ;;  %v4856_v1 = vld [vmem:[%s6727_s1 + $0x24c] ss:$16 sps:$4 sm:$0xff]  }
  0x2e   : > { %2191 = vmatprep.subr.bf16.mxu1 %v4778_v37  ;;  %v458_v37 = vpack.c.bf16 %v360_v30, %v353_v29  ;;  %v4845_v52 = vld [vmem:[%s6727_s1 + $0x240] ss:$16 sps:$4 sm:$0xff]   ;;  %v4874_v25 = vld [vmem:[%s6727_s1 + $0x2ac] ss:$16 sps:$4 sm:$0xff]   ;;  %v4883_v30 = vld [vmem:[%s6727_s1 + $0x304] ss:$16 sps:$4 sm:$0xff]  }
  0x2f   : > { %1746 = vmatpush1.bf16.msra.mxu0 %v4787_v44  ;;  %v359_v44 = vld [vmem:[%s5349_s17 + $0xa8] sm:$0xff]  ;;  %v4857_v4 = vld [vmem:[%s6727_s1 + $0x280] ss:$16 sps:$4 sm:$0xff]   ;;  %v401_v29 = vld [vmem:[%s5349_s17 + $0x1f8] sm:$0xff] }
  0x30   : > { %1747 = vmatprep.subr.bf16.mxu0 %v4791_v46  ;;  %v4847_v46 = vld [vmem:[%s6727_s1 + $0x244] ss:$16 sps:$4 sm:$0xff]   ;;  %v4875_v27 = vld [vmem:[%s6727_s1 + $0x2e0] ss:$16 sps:$4 sm:$0xff]  }
  0x31   : > { %2192 = vmatpush1.bf16.msra.mxu1 %v4776_v38  ;;  %v5579_v38 = vpack.c.bf16 %v449_v32, %v442_v31  ;;  %v402_v16 = vld [vmem:[%s5349_s17 + $0x200] sm:$0xff]  ;;  %v409_v31 = vld [vmem:[%s5349_s17 + $0x238] sm:$0xff]  ;;  %v416_v32 = vld [vmem:[%s5349_s17 + $0x270] sm:$0xff] }
  0x32   : > { %2193 = vmatprep.subr.bf16.mxu1 %v4784_v43  ;;  %v352_v43 = vld [vmem:[%s5349_s17 + $0x70] sm:$0xff] }
  0x33   : > { %1748 = vmatpush1.bf16.msra.mxu0 %v4793_v49  ;;  %v4836_v49 = vld [vmem:[%s6727_s1 + $0x1e8] ss:$16 sps:$4 sm:$0xff]  }
  0x34   : > { %4137 = vmatmul.mubr.msk.bf16.gmra.mrb[12].mxu1 %vm1704_vm0, %v5446_v45  ;;  %1749 = vmatprep.subr.bf16.mxu0 %v4797_v51  ;;  %v457_v51 = vpack.c.bf16 %v359_v44, %v352_v43  ;;  %v4887_v43 = vld [vmem:[%s6727_s1 + $0x320] ss:$16 sps:$4 sm:$0xff]  }
  0x35   : > { %2194 = vmatpush1.bf16.msra.mxu1 %v4782_v47  ;;  %2140 = vmatprep.mubr.bf16.mxu1 %v5215_v2  ;;  %v367_v47 = vld [vmem:[%s5349_s17 + $0xe8] sm:$0xff]  ;;  %v408_v44 = vld [vmem:[%s5349_s17 + $0x230] sm:$0xff] }
  0x36   : > { %2195 = vmatprep.subr.bf16.mxu1 %v4790_v48  ;;  %v374_v48 = vld [vmem:[%s5349_s17 + $0x120] sm:$0xff] }
  0x37   : > { %1750 = vmatpush1.bf16.msra.mxu0 %v4799_v55  ;;  %v465_v53 = vpack.c.bf16 %v374_v48, %v367_v47  ;;  %v4842_v55 = vld [vmem:[%s6727_s1 + $0x208] ss:$16 sps:$4 sm:$0xff]   ;;  %v4895_v47 = vld [vmem:[%s6727_s1 + $0x344] ss:$16 sps:$4 sm:$0xff]  }
  0x38   : > { %1751 = vmatprep.subr.bf16.mxu0 %v4803_v57  ;;  %v4850_v57 = vld [vmem:[%s6727_s1 + $0x22c] ss:$16 sps:$4 sm:$0xff]  }
  0x39   : > { %2196 = vmatpush1.bf16.msra.mxu1 %v4788_v50  ;;  %v4844_v50 = vld [vmem:[%s6727_s1 + $0x20c] ss:$16 sps:$4 sm:$0xff]  }
  0x3a   : > { %2197 = vmatprep.subr.bf16.mxu1 %v4796_v54  ;;  %v4853_v54 = vld [vmem:[%s6727_s1 + $0x264] ss:$16 sps:$4 sm:$0xff]   ;;  %v423_v48 = vld [vmem:[%s5349_s17 + $0x2a8] sm:$0xff] }
  0x3b   : > { %1752 = vmatpush1.bf16.msra.mxu0 %v4805_v61  ;;  %v4859_v61 = vld [vmem:[%s6727_s1 + $0x284] ss:$16 sps:$4 sm:$0xff]  }
  0x3c   : > { %4138 = vmatmul.mubr.msk.bf16.gmra.mrb[16].mxu1 %vm1704_vm0, %v5477_v56  ;;  %1753 = vmatprep.subr.bf16.mxu0 %v4809_v63  ;;  %v388_v63 = vld [vmem:[%s5349_s17 + $0x190] sm:$0xff] }
  0x3d   : > { %2198 = vmatpush1.bf16.msra.mxu1 %v4794_v58  ;;  %2150 = vmatprep.mubr.bf16.mxu1 %v5215_v2  ;;  %v4851_v58 = vld [vmem:[%s6727_s1 + $0x260] ss:$16 sps:$4 sm:$0xff]  }
  0x3e   : > { %2199 = vmatprep.subr.bf16.mxu1 %v4802_v59  ;;  %v366_v59 = vld [vmem:[%s5349_s17 + $0xe0] sm:$0xff] }
  0x3f   : > { %1754 = vmatpush1.bf16.msra.mxu0 %v4811_v5 }
  0x40   : > { %1755 = vmatprep.subr.bf16.mxu0 %v4815_v8  ;;  %v4865_v8 = vld [vmem:[%s6727_s1 + $0x2a4] ss:$16 sps:$4 sm:$0xff]  }
  0x41   : > { %2200 = vmatpush1.bf16.msra.mxu1 %v4800_v60  ;;  %v373_v60 = vld [vmem:[%s5349_s17 + $0x118] sm:$0xff] }
  0x42   : > { %2201 = vmatprep.subr.bf16.mxu1 %v4808_v62  ;;  %v381_v62 = vld [vmem:[%s5349_s17 + $0x158] sm:$0xff]  ;;  %v464_v3 = vpack.c.bf16 %v373_v60, %v366_v59  ;;  %v4899_v59 = vld [vmem:[%s6727_s1 + $0x360] ss:$16 sps:$4 sm:$0xff]  }
  0x43   : > { %1756 = vmatpush1.bf16.msra.mxu0 %v4817_v11  ;;  %v472_v5 = vpack.c.bf16 %v388_v63, %v381_v62  ;;  %v380_v11 = vld [vmem:[%s5349_s17 + $0x150] sm:$0xff]  ;;  %v422_v60 = vld [vmem:[%s5349_s17 + $0x2a0] sm:$0xff]  ;;  %v437_v63 = vld [vmem:[%s5349_s17 + $0x318] sm:$0xff] }
  0x44   : > { %4139 = vmatmul.mubr.msk.bf16.gmra.mrb[20].mxu1 %vm1704_vm0, %v5512_v7  ;;  %1757 = vmatprep.subr.bf16.mxu0 %v4821_v12  ;;  %v387_v12 = vld [vmem:[%s5349_s17 + $0x188] sm:$0xff]  ;;  %v4907_v62 = vld [vmem:[%s6727_s1 + $0x384] ss:$16 sps:$4 sm:$0xff]  }
  0x45   : > { %2202 = vmatpush1.bf16.msra.mxu1 %v4806_v9  ;;  %2160 = vmatprep.mubr.bf16.mxu1 %v5215_v2  ;;  %v4862_v9 = vld [vmem:[%s6727_s1 + $0x26c] ss:$16 sps:$4 sm:$0xff]  }
  0x46   : > { %2203 = vmatprep.subr.bf16.mxu1 %v4814_v10  ;;  %v4863_v10 = vld [vmem:[%s6727_s1 + $0x2a0] ss:$16 sps:$4 sm:$0xff]  }
  0x47   : > { %1758 = vmatpush1.bf16.msra.mxu0 %v4823_v19  ;;  %v471_v19 = vpack.c.bf16 %v387_v12, %v380_v11  ;;  %v4911_v11 = vld [vmem:[%s6727_s1 + $0x3a0] ss:$16 sps:$4 sm:$0xff]  }
  0x48   : > { %1759 = vmatprep.subr.bf16.mxu0 %v4827_v21  ;;  %v4869_v21 = vld [vmem:[%s6727_s1 + $0x2c0] ss:$16 sps:$4 sm:$0xff]  }
  0x49   : > { %2204 = vmatpush1.bf16.msra.mxu1 %v4812_v13  ;;  %v4871_v13 = vld [vmem:[%s6727_s1 + $0x2c4] ss:$16 sps:$4 sm:$0xff]  }
  0x4a   : > { %2205 = vmatprep.subr.bf16.mxu1 %v4820_v17  ;;  %v4860_v17 = vld [vmem:[%s6727_s1 + $0x268] ss:$16 sps:$4 sm:$0xff]   ;;  %v436_v12 = vld [vmem:[%s5349_s17 + $0x310] sm:$0xff] }
  0x4b   : > { %1760 = vmatpush1.bf16.msra.mxu0 %v4829_v24  ;;  %v4866_v24 = vld [vmem:[%s6727_s1 + $0x288] ss:$16 sps:$4 sm:$0xff]  }
  0x4c   : > { %4140 = vmatmul.mubr.msk.bf16.gmra.mrb[24].mxu1 %vm1704_vm0, %v5547_v20  ;;  %1842 = vmatprep.subr.bf16.mxu0 %v4835_v28  ;;  %v394_v28 = vld [vmem:[%s5349_s17 + $0x1c0] sm:$0xff] }
  0x4d   : > { %2206 = vmatpush1.bf16.msra.mxu1 %v4818_v18  ;;  %2170 = vmatprep.mubr.bf16.mxu1 %v5215_v2  ;;  %v4868_v18 = vld [vmem:[%s6727_s1 + $0x28c] ss:$16 sps:$4 sm:$0xff]  }
  0x4e   : > { %2207 = vmatprep.subr.bf16.mxu1 %v4826_v22  ;;  %1762 = vmatmul.mubr.bf16.vlgmr.msra.gmra.mrb[0].mxu0 %v450_v35  ;;  %v479_v22 = vpack.c.bf16 %v402_v16, %v395_v15  ;;  %v4919_v15 = vld [vmem:[%s6727_s1 + $0x3c4] ss:$16 sps:$4 sm:$0xff]   ;;  %v341_v16 = vld [vmem:[%s5349_s17 + $0x18] sm:$0xff] }
  0x4f   : > { %1843 = vmatpush1.bf16.msra.mxu0 %v4833_v36  ;;  %1771 = vmatprep.mubr.bf16.mxu0 %v458_v37  ;;  %v478_v36 = vpack.c.bf16 %v401_v29, %v394_v28  ;;  %v4923_v28 = vld [vmem:[%s6727_s1 + $0x3e0] ss:$16 sps:$4 sm:$0xff]  }
  0x50   : > { %1844 = vmatprep.subr.bf16.mxu0 %v4841_v39  ;;  %v4881_v39 = vld [vmem:[%s6727_s1 + $0x300] ss:$16 sps:$4 sm:$0xff]  }
  0x51   : > { %2208 = vmatpush1.bf16.msra.mxu1 %v4824_v26  ;;  %v4877_v26 = vld [vmem:[%s6727_s1 + $0x2e4] ss:$16 sps:$4 sm:$0xff]  }
  0x52   : > { %2209 = vmatprep.subr.bf16.mxu1 %v4832_v33  ;;  %v4872_v33 = vld [vmem:[%s6727_s1 + $0x2a8] ss:$16 sps:$4 sm:$0xff]   ;;  %v340_v29 = vld [vmem:[%s5349_s17 + $0x10] sm:$0xff] }
  0x53   : > { %1845 = vmatpush1.bf16.msra.mxu0 %v4839_v42  ;;  %v4886_v42 = vld [vmem:[%s6727_s1 + $0x2ec] ss:$16 sps:$4 sm:$0xff]  }
  0x54   : > { %4141 = vmatmul.mubr.msk.bf16.gmra.mrb[28].mxu1 %vm1704_vm0, %v5579_v38  ;;  %1846 = vmatprep.subr.bf16.mxu0 %v4847_v46  ;;  %v415_v46 = vld [vmem:[%s5349_s17 + $0x268] sm:$0xff] }
  0x55   : > { %2210 = vmatpush1.bf16.msra.mxu1 %v4830_v40  ;;  %2213 = vmatprep.mubr.bf16.mxu1 %v5510_v6  ;;  %v4854_v6 = vld [vmem:[%s6727_s1 + $0x248] ss:$16 sps:$4 sm:$0xff]   ;;  %v486_v40 = vpack.c.bf16 %v416_v32, %v409_v31  ;;  %v4931_v31 = vld [vmem:[%s6727_s1 + $0x404] ss:$16 sps:$4 sm:$0xff]  }
  0x56   : > { %2211 = vmatprep.subr.bf16.mxu1 %v4838_v41  ;;  %1772 = vmatmul.mubr.bf16.gmra.mrb[4].mxu0 %v457_v51  ;;  %v4889_v41 = vld [vmem:[%s6727_s1 + $0x324] ss:$16 sps:$4 sm:$0xff]   ;;  %v355_v32 = vld [vmem:[%s5349_s17 + $0x88] sm:$0xff] }
  0x57   : > { %1847 = vmatpush1.bf16.msra.mxu0 %v4845_v52  ;;  %1781 = vmatprep.mubr.bf16.mxu0 %v465_v53  ;;  %v485_v52 = vpack.c.bf16 %v415_v46, %v408_v44  ;;  %v4935_v44 = vld [vmem:[%s6727_s1 + $0x420] ss:$16 sps:$4 sm:$0xff]  }
  0x58   : > { %1848 = vmatprep.subr.bf16.mxu0 %v4853_v54  ;;  %v354_v46 = vld [vmem:[%s5349_s17 + $0x80] sm:$0xff] }
  0x59   : > { %2212 = vmatpush1.bf16.msra.mxu1 %v4836_v49  ;;  %v430_v49 = vld [vmem:[%s5349_s17 + $0x2e0] sm:$0xff] }
  0x5a   : > { %2294 = vmatprep.subr.bf16.mxu1 %v4844_v50  ;;  %v4884_v50 = vld [vmem:[%s6727_s1 + $0x2e8] ss:$16 sps:$4 sm:$0xff]   ;;  %v493_v54 = vpack.c.bf16 %v430_v49, %v423_v48  ;;  %v4943_v48 = vld [vmem:[%s6727_s1 + $0x444] ss:$16 sps:$4 sm:$0xff]  }
  0x5b   : > { %1849 = vmatpush1.bf16.msra.mxu0 %v4851_v58  ;;  %v4898_v58 = vld [vmem:[%s6727_s1 + $0x32c] ss:$16 sps:$4 sm:$0xff]  }
  0x5c   : > { %2214 = vmatmul.mubr.bf16.vlgmr.msra.gmra.mrb[32].mxu1 %v450_v35  ;;  %1850 = vmatprep.subr.bf16.mxu0 %v4859_v61  ;;  %v4880_v35 = vld [vmem:[%s6727_s1 + $0x2cc] ss:$16 sps:$4 sm:$0xff]  }
  0x5d   : > { %2295 = vmatpush1.bf16.msra.mxu1 %v4842_v55  ;;  %2223 = vmatprep.mubr.bf16.mxu1 %v458_v37  ;;  %v4878_v37 = vld [vmem:[%s6727_s1 + $0x2c8] ss:$16 sps:$4 sm:$0xff]   ;;  %v4901_v55 = vld [vmem:[%s6727_s1 + $0x364] ss:$16 sps:$4 sm:$0xff]  }
  0x5e   : > { %2296 = vmatprep.subr.bf16.mxu1 %v4850_v57  ;;  %1782 = vmatmul.mubr.bf16.gmra.mrb[8].mxu0 %v464_v3  ;;  %v4890_v57 = vld [vmem:[%s6727_s1 + $0x308] ss:$16 sps:$4 sm:$0xff]  }
  0x5f   : > { %1851 = vmatpush1.bf16.msra.mxu0 %v4857_v4  ;;  %1791 = vmatprep.mubr.bf16.mxu0 %v472_v5  ;;  %v429_v61 = vld [vmem:[%s5349_s17 + $0x2d8] sm:$0xff] }
  0x60   : > { %1852 = vmatprep.subr.bf16.mxu0 %v4865_v8  ;;  %v492_v4 = vpack.c.bf16 %v429_v61, %v422_v60  ;;  %v4913_v8 = vld [vmem:[%s6727_s1 + $0x3a4] ss:$16 sps:$4 sm:$0xff]   ;;  %v369_v49 = vld [vmem:[%s5349_s17 + $0xf8] sm:$0xff]  ;;  %v4947_v60 = vld [vmem:[%s6727_s1 + $0x460] ss:$16 sps:$4 sm:$0xff]  }
  0x61   : > { %2297 = vmatpush1.bf16.msra.mxu1 %v4848_v0  ;;  %v444_v0 = vld [vmem:[%s5349_s17 + $0x350] sm:$0xff] }
  0x62   : > { %2298 = vmatprep.subr.bf16.mxu1 %v4856_v1  ;;  %v4896_v1 = vld [vmem:[%s6727_s1 + $0x328] ss:$16 sps:$4 sm:$0xff]   ;;  %v368_v61 = vld [vmem:[%s5349_s17 + $0xf0] sm:$0xff] }
  0x63   : > { %1853 = vmatpush1.bf16.msra.mxu0 %v4863_v10  ;;  %v4910_v10 = vld [vmem:[%s6727_s1 + $0x36c] ss:$16 sps:$4 sm:$0xff]  }
  0x64   : > { %2224 = vmatmul.mubr.bf16.gmra.mrb[36].mxu1 %v457_v51  ;;  %1854 = vmatprep.subr.bf16.mxu0 %v4871_v13  ;;  %v4892_v51 = vld [vmem:[%s6727_s1 + $0x30c] ss:$16 sps:$4 sm:$0xff]  }
  0x65   : > { %2299 = vmatpush1.bf16.msra.mxu1 %v4854_v6  ;;  %2233 = vmatprep.mubr.bf16.mxu1 %v465_v53  ;;  %v4893_v53 = vld [vmem:[%s6727_s1 + $0x340] ss:$16 sps:$4 sm:$0xff]   ;;  %v500_v6 = vpack.c.bf16 %v444_v0, %v437_v63  ;;  %v443_v13 = vld [vmem:[%s5349_s17 + $0x348] sm:$0xff]  ;;  %v4955_v63 = vld [vmem:[%s6727_s1 + $0x484] ss:$16 sps:$4 sm:$0xff]  }
  0x66   : > { %2300 = vmatprep.subr.bf16.mxu1 %v4862_v9  ;;  %1792 = vmatmul.mubr.bf16.gmra.mrb[12].mxu0 %v471_v19  ;;  %v4902_v9 = vld [vmem:[%s6727_s1 + $0x348] ss:$16 sps:$4 sm:$0xff]  }
  0x67   : > { %1855 = vmatpush1.bf16.msra.mxu0 %v4869_v21  ;;  %1801 = vmatprep.mubr.bf16.mxu0 %v479_v22  ;;  %v499_v21 = vpack.c.bf16 %v443_v13, %v436_v12  ;;  %v383_v0 = vld [vmem:[%s5349_s17 + $0x168] sm:$0xff]  ;;  %v4959_v12 = vld [vmem:[%s6727_s1 + $0x4a0] ss:$16 sps:$4 sm:$0xff]  }
  0x68   : > { %1856 = vmatprep.subr.bf16.mxu0 %v4877_v26  ;;  %v4925_v26 = vld [vmem:[%s6727_s1 + $0x3e4] ss:$16 sps:$4 sm:$0xff]  }
  0x69   : > { %2301 = vmatpush1.bf16.msra.mxu1 %v4860_v17  ;;  %v348_v17 = vld [vmem:[%s5349_s17 + $0x50] sm:$0xff]  ;;  %v382_v13 = vld [vmem:[%s5349_s17 + $0x160] sm:$0xff] }
  0x6a   : > { %2302 = vmatprep.subr.bf16.mxu1 %v4868_v18  ;;  %v4908_v18 = vld [vmem:[%s6727_s1 + $0x368] ss:$16 sps:$4 sm:$0xff]  }
  0x6b   : > { %1857 = vmatpush1.bf16.msra.mxu0 %v4875_v27  ;;  %v4922_v27 = vld [vmem:[%s6727_s1 + $0x3ac] ss:$16 sps:$4 sm:$0xff]  }
  0x6c   : > { %2234 = vmatmul.mubr.bf16.gmra.mrb[40].mxu1 %v464_v3  ;;  %1858 = vmatprep.subr.bf16.mxu0 %v4883_v30  ;;  %v4904_v3 = vld [vmem:[%s6727_s1 + $0x34c] ss:$16 sps:$4 sm:$0xff]  }
  0x6d   : > { %2303 = vmatpush1.bf16.msra.mxu1 %v4866_v24  ;;  %2243 = vmatprep.mubr.bf16.mxu1 %v472_v5  ;;  %v4905_v5 = vld [vmem:[%s6727_s1 + $0x380] ss:$16 sps:$4 sm:$0xff]   ;;  %v453_v24 = vpack.c.bf16 %v348_v17, %v341_v16  ;;  %v347_v30 = vld [vmem:[%s5349_s17 + $0x48] sm:$0xff]  ;;  %v4967_v16 = vld [vmem:[%s6727_s1 + $0x4c4] ss:$16 sps:$4 sm:$0xff]  }
  0x6e   : > { %2304 = vmatprep.subr.bf16.mxu1 %v4874_v25  ;;  %1802 = vmatmul.mubr.bf16.gmra.mrb[16].mxu0 %v478_v36  ;;  %v4914_v25 = vld [vmem:[%s6727_s1 + $0x388] ss:$16 sps:$4 sm:$0xff]  }
  0x6f   : > { %1859 = vmatpush1.bf16.msra.mxu0 %v4881_v39  ;;  %1811 = vmatprep.mubr.bf16.mxu0 %v486_v40  ;;  %v4929_v39 = vld [vmem:[%s6727_s1 + $0x400] ss:$16 sps:$4 sm:$0xff]   ;;  %v397_v17 = vld [vmem:[%s5349_s17 + $0x1d8] sm:$0xff] }
  0x70   : > { %1860 = vmatprep.subr.bf16.mxu0 %v4889_v41  ;;  %v4926_v41 = vld [vmem:[%s6727_s1 + $0x3c8] ss:$16 sps:$4 sm:$0xff]  }
  0x71   : > { %2305 = vmatpush1.bf16.msra.mxu1 %v4872_v33  ;;  %v362_v33 = vld [vmem:[%s5349_s17 + $0xc0] sm:$0xff] }
  0x72   : > { %2306 = vmatprep.subr.bf16.mxu1 %v4880_v35  ;;  %v4920_v35 = vld [vmem:[%s6727_s1 + $0x3a8] ss:$16 sps:$4 sm:$0xff]  }
  0x73   : > { %1861 = vmatpush1.bf16.msra.mxu0 %v4887_v43  ;;  %v4937_v43 = vld [vmem:[%s6727_s1 + $0x424] ss:$16 sps:$4 sm:$0xff]  }
  0x74   : > { %2244 = vmatmul.mubr.bf16.gmra.mrb[44].mxu1 %v471_v19  ;;  %1862 = vmatprep.subr.bf16.mxu0 %v4895_v47  ;;  %v4916_v19 = vld [vmem:[%s6727_s1 + $0x38c] ss:$16 sps:$4 sm:$0xff]  }
  0x75   : > { %2307 = vmatpush1.bf16.msra.mxu1 %v4878_v37  ;;  %2253 = vmatprep.mubr.bf16.mxu1 %v479_v22  ;;  %v4917_v22 = vld [vmem:[%s6727_s1 + $0x3c0] ss:$16 sps:$4 sm:$0xff]   ;;  %v452_v37 = vpack.c.bf16 %v347_v30, %v340_v29  ;;  %v361_v47 = vld [vmem:[%s5349_s17 + $0xb8] sm:$0xff] }
  0x76   : > { %2308 = vmatprep.subr.bf16.mxu1 %v4886_v42  ;;  %1812 = vmatmul.mubr.bf16.gmra.mrb[20].mxu0 %v485_v52  ;;  %v4934_v42 = vld [vmem:[%s6727_s1 + $0x3ec] ss:$16 sps:$4 sm:$0xff]   ;;  %v4971_v29 = vld [vmem:[%s6727_s1 + $0x4e0] ss:$16 sps:$4 sm:$0xff]  }
  0x77   : > { %1863 = vmatpush1.bf16.msra.mxu0 %v4893_v53  ;;  %1821 = vmatprep.mubr.bf16.mxu0 %v493_v54  ;;  %v459_v53 = vpack.c.bf16 %v361_v47, %v354_v46  ;;  %v396_v30 = vld [vmem:[%s5349_s17 + $0x1d0] sm:$0xff]  ;;  %v410_v47 = vld [vmem:[%s5349_s17 + $0x240] sm:$0xff] }
  0x78   : > { %1864 = vmatprep.subr.bf16.mxu0 %v4901_v55  ;;  %v4941_v55 = vld [vmem:[%s6727_s1 + $0x440] ss:$16 sps:$4 sm:$0xff]  }
  0x79   : > { %2309 = vmatpush1.bf16.msra.mxu1 %v4884_v50  ;;  %v376_v50 = vld [vmem:[%s5349_s17 + $0x130] sm:$0xff] }
  0x7a   : > { %2310 = vmatprep.subr.bf16.mxu1 %v4892_v51  ;;  %v4932_v51 = vld [vmem:[%s6727_s1 + $0x3e8] ss:$16 sps:$4 sm:$0xff]   ;;  %v4983_v46 = vld [vmem:[%s6727_s1 + $0x520] ss:$16 sps:$4 sm:$0xff]  }
  0x7b   : > { %1865 = vmatpush1.bf16.msra.mxu0 %v4899_v59  ;;  %v4946_v59 = vld [vmem:[%s6727_s1 + $0x42c] ss:$16 sps:$4 sm:$0xff]  }
  0x7c   : > { %2254 = vmatmul.mubr.bf16.gmra.mrb[48].mxu1 %v478_v36  ;;  %1866 = vmatprep.subr.bf16.mxu0 %v4907_v62  ;;  %v4928_v36 = vld [vmem:[%s6727_s1 + $0x3cc] ss:$16 sps:$4 sm:$0xff]  }
  0x7d   : > { %2311 = vmatpush1.bf16.msra.mxu1 %v4890_v57  ;;  %2263 = vmatprep.mubr.bf16.mxu1 %v486_v40  ;;  %v460_v40 = vpack.c.bf16 %v362_v33, %v355_v32  ;;  %v467_v57 = vpack.c.bf16 %v376_v50, %v369_v49  ;;  %v375_v62 = vld [vmem:[%s5349_s17 + $0x128] sm:$0xff]  ;;  %v4979_v32 = vld [vmem:[%s6727_s1 + $0x504] ss:$16 sps:$4 sm:$0xff]   ;;  %v425_v50 = vld [vmem:[%s5349_s17 + $0x2b8] sm:$0xff] }
  0x7e   : > { %2312 = vmatprep.subr.bf16.mxu1 %v4898_v58  ;;  %1822 = vmatmul.mubr.bf16.gmra.mrb[24].mxu0 %v492_v4  ;;  %v4949_v58 = vld [vmem:[%s6727_s1 + $0x464] ss:$16 sps:$4 sm:$0xff]   ;;  %v411_v33 = vld [vmem:[%s5349_s17 + $0x248] sm:$0xff] }
  0x7f   : > { %1867 = vmatpush1.bf16.msra.mxu0 %v4905_v5  ;;  %1831 = vmatprep.mubr.bf16.mxu0 %v500_v6  ;;  %v466_v5 = vpack.c.bf16 %v375_v62, %v368_v61  ;;  %v4991_v49 = vld [vmem:[%s6727_s1 + $0x544] ss:$16 sps:$4 sm:$0xff]   ;;  %v4995_v61 = vld [vmem:[%s6727_s1 + $0x560] ss:$16 sps:$4 sm:$0xff]  }
  0x80   : > { %1868 = vmatprep.subr.bf16.mxu0 %v4913_v8  ;;  %v424_v62 = vld [vmem:[%s5349_s17 + $0x2b0] sm:$0xff] }
  0x81   : > { %2313 = vmatpush1.bf16.msra.mxu1 %v4896_v1  ;;  %v390_v1 = vld [vmem:[%s5349_s17 + $0x1a0] sm:$0xff] }
  0x82   : > { %2314 = vmatprep.subr.bf16.mxu1 %v4904_v3  ;;  %v4944_v3 = vld [vmem:[%s6727_s1 + $0x428] ss:$16 sps:$4 sm:$0xff]   ;;  %v474_v8 = vpack.c.bf16 %v390_v1, %v383_v0  ;;  %v5003_v0 = vld [vmem:[%s6727_s1 + $0x584] ss:$16 sps:$4 sm:$0xff]  }
  0x83   : > { %1869 = vmatpush1.bf16.msra.mxu0 %v4911_v11  ;;  %v4958_v11 = vld [vmem:[%s6727_s1 + $0x46c] ss:$16 sps:$4 sm:$0xff]  }
  0x84   : > { %2264 = vmatmul.mubr.bf16.gmra.mrb[52].mxu1 %v485_v52  ;;  %1870 = vmatprep.subr.bf16.mxu0 %v4919_v15  ;;  %v4940_v52 = vld [vmem:[%s6727_s1 + $0x40c] ss:$16 sps:$4 sm:$0xff]  }
  0x85   : > { %2315 = vmatpush1.bf16.msra.mxu1 %v4902_v9  ;;  %2273 = vmatprep.mubr.bf16.mxu1 %v493_v54  ;;  %v4938_v54 = vld [vmem:[%s6727_s1 + $0x408] ss:$16 sps:$4 sm:$0xff]   ;;  %v4961_v9 = vld [vmem:[%s6727_s1 + $0x4a4] ss:$16 sps:$4 sm:$0xff]  }
  0x86   : > { %2316 = vmatprep.subr.bf16.mxu1 %v4910_v10  ;;  %1832 = vmatmul.mubr.bf16.gmra.mrb[28].mxu0 %v499_v21  ;;  %v4950_v10 = vld [vmem:[%s6727_s1 + $0x448] ss:$16 sps:$4 sm:$0xff]  }
  0x87   : > { %1871 = vmatpush1.bf16.msra.mxu0 %v4917_v22  ;;  %1874 = vmatprep.mubr.bf16.mxu0 %v453_v24  ;;  %v389_v15 = vld [vmem:[%s5349_s17 + $0x198] sm:$0xff]  ;;  %v439_v1 = vld [vmem:[%s5349_s17 + $0x328] sm:$0xff] }
  0x88   : > { %1872 = vmatprep.subr.bf16.mxu0 %v4925_v26  ;;  %v473_v22 = vpack.c.bf16 %v389_v15, %v382_v13  ;;  %v4973_v26 = vld [vmem:[%s6727_s1 + $0x4e4] ss:$16 sps:$4 sm:$0xff]   ;;  %v5007_v13 = vld [vmem:[%s6727_s1 + $0x5a0] ss:$16 sps:$4 sm:$0xff]  }
  0x89   : > { %2317 = vmatpush1.bf16.msra.mxu1 %v4908_v18  ;;  %v404_v18 = vld [vmem:[%s5349_s17 + $0x210] sm:$0xff]  ;;  %v438_v15 = vld [vmem:[%s5349_s17 + $0x320] sm:$0xff] }
  0x8a   : > { %2318 = vmatprep.subr.bf16.mxu1 %v4916_v19  ;;  %v4956_v19 = vld [vmem:[%s6727_s1 + $0x468] ss:$16 sps:$4 sm:$0xff]  }
  0x8b   : > { %1873 = vmatpush1.bf16.msra.mxu0 %v4923_v28  ;;  %v4970_v28 = vld [vmem:[%s6727_s1 + $0x4ac] ss:$16 sps:$4 sm:$0xff]  }
  0x8c   : > { %2274 = vmatmul.mubr.bf16.gmra.mrb[56].mxu1 %v492_v4  ;;  %1955 = vmatprep.subr.bf16.mxu0 %v4931_v31  ;;  %v4952_v4 = vld [vmem:[%s6727_s1 + $0x44c] ss:$16 sps:$4 sm:$0xff]  }
  0x8d   : > { %2319 = vmatpush1.bf16.msra.mxu1 %v4914_v25  ;;  %2283 = vmatprep.mubr.bf16.mxu1 %v500_v6  ;;  %v4953_v6 = vld [vmem:[%s6727_s1 + $0x480] ss:$16 sps:$4 sm:$0xff]   ;;  %v481_v25 = vpack.c.bf16 %v404_v18, %v397_v17  ;;  %v403_v31 = vld [vmem:[%s5349_s17 + $0x208] sm:$0xff]  ;;  %v5015_v17 = vld [vmem:[%s6727_s1 + $0x5c4] ss:$16 sps:$4 sm:$0xff]  }
  0x8e   : > { %2320 = vmatprep.subr.bf16.mxu1 %v4922_v27  ;;  %1875 = vmatmul.mubr.bf16.vlgmr.msra.gmra.mrb[0].mxu0 %v452_v37  ;;  %v4962_v27 = vld [vmem:[%s6727_s1 + $0x488] ss:$16 sps:$4 sm:$0xff]  }
  0x8f   : > { %1956 = vmatpush1.bf16.msra.mxu0 %v4929_v39  ;;  %1884 = vmatprep.mubr.bf16.mxu0 %v460_v40  ;;  %v480_v39 = vpack.c.bf16 %v403_v31, %v396_v30  ;;  %v343_v18 = vld [vmem:[%s5349_s17 + $0x28] sm:$0xff]  ;;  %v5019_v30 = vld [vmem:[%s6727_s1 + $0x5e0] ss:$16 sps:$4 sm:$0xff]  }
  0x90   : > { %1957 = vmatprep.subr.bf16.mxu0 %v4937_v43  ;;  %v4974_v43 = vld [vmem:[%s6727_s1 + $0x4c8] ss:$16 sps:$4 sm:$0xff]   ;;  %v342_v31 = vld [vmem:[%s5349_s17 + $0x20] sm:$0xff] }
  0x91   : > { %2321 = vmatpush1.bf16.msra.mxu1 %v4920_v35  ;;  %v418_v35 = vld [vmem:[%s5349_s17 + $0x280] sm:$0xff] }
  0x92   : > { %2322 = vmatprep.subr.bf16.mxu1 %v4928_v36  ;;  %v4968_v36 = vld [vmem:[%s6727_s1 + $0x4a8] ss:$16 sps:$4 sm:$0xff]  }
  0x93   : > { %1958 = vmatpush1.bf16.msra.mxu0 %v4935_v44  ;;  %v4982_v44 = vld [vmem:[%s6727_s1 + $0x4ec] ss:$16 sps:$4 sm:$0xff]  }
  0x94   : > { %2284 = vmatmul.mubr.bf16.gmra.mrb[60].mxu1 %v499_v21  ;;  %1959 = vmatprep.subr.bf16.mxu0 %v4943_v48  ;;  %v4964_v21 = vld [vmem:[%s6727_s1 + $0x48c] ss:$16 sps:$4 sm:$0xff]  }
  0x95   : > { %2323 = vmatpush1.bf16.msra.mxu1 %v4926_v41  ;;  %2326 = vmatprep.mubr.bf16.mxu1 %v453_v24  ;;  %v4965_v24 = vld [vmem:[%s6727_s1 + $0x4c0] ss:$16 sps:$4 sm:$0xff]   ;;  %v488_v41 = vpack.c.bf16 %v418_v35, %v411_v33  ;;  %v417_v48 = vld [vmem:[%s5349_s17 + $0x278] sm:$0xff] }
  0x96   : > { %2324 = vmatprep.subr.bf16.mxu1 %v4934_v42  ;;  %1885 = vmatmul.mubr.bf16.gmra.mrb[4].mxu0 %v459_v53  ;;  %v4985_v42 = vld [vmem:[%s6727_s1 + $0x524] ss:$16 sps:$4 sm:$0xff]   ;;  %v357_v33 = vld [vmem:[%s5349_s17 + $0x98] sm:$0xff] }
  0x97   : > { %1960 = vmatpush1.bf16.msra.mxu0 %v4941_v55  ;;  %1894 = vmatprep.mubr.bf16.mxu0 %v467_v57  ;;  %v4986_v55 = vld [vmem:[%s6727_s1 + $0x508] ss:$16 sps:$4 sm:$0xff]   ;;  %v364_v35 = vld [vmem:[%s5349_s17 + $0xd0] sm:$0xff] }
  0x98   : > { %1961 = vmatprep.subr.bf16.mxu0 %v4949_v58  ;;  %v4997_v58 = vld [vmem:[%s6727_s1 + $0x564] ss:$16 sps:$4 sm:$0xff]  }
  0x99   : > { %2325 = vmatpush1.bf16.msra.mxu1 %v4932_v51  ;;  %v432_v51 = vld [vmem:[%s5349_s17 + $0x2f0] sm:$0xff] }
  0x9a   : > { %2407 = vmatprep.subr.bf16.mxu1 %v4940_v52  ;;  %v4980_v52 = vld [vmem:[%s6727_s1 + $0x4e8] ss:$16 sps:$4 sm:$0xff]  }
  0x9b   : > { %1962 = vmatpush1.bf16.msra.mxu0 %v4947_v60  ;;  %v4994_v60 = vld [vmem:[%s6727_s1 + $0x52c] ss:$16 sps:$4 sm:$0xff]  }
  0x9c   : > { %2327 = vmatmul.mubr.bf16.vlgmr.msra.gmra.mrb[32].mxu1 %v452_v37  ;;  %1963 = vmatprep.subr.bf16.mxu0 %v4955_v63  ;;  %v4976_v37 = vld [vmem:[%s6727_s1 + $0x4cc] ss:$16 sps:$4 sm:$0xff]  }
  0x9d   : > { %2408 = vmatpush1.bf16.msra.mxu1 %v4938_v54  ;;  %2336 = vmatprep.mubr.bf16.mxu1 %v460_v40  ;;  %v4977_v40 = vld [vmem:[%s6727_s1 + $0x500] ss:$16 sps:$4 sm:$0xff]   ;;  %v487_v54 = vpack.c.bf16 %v417_v48, %v410_v47  ;;  %v431_v63 = vld [vmem:[%s5349_s17 + $0x2e8] sm:$0xff] }
  0x9e   : > { %2409 = vmatprep.subr.bf16.mxu1 %v4946_v59  ;;  %1895 = vmatmul.mubr.bf16.gmra.mrb[8].mxu0 %v466_v5  ;;  %v495_v59 = vpack.c.bf16 %v432_v51, %v425_v50  ;;  %v378_v47 = vld [vmem:[%s5349_s17 + $0x140] sm:$0xff]  ;;  %v5025_v50 = vld [vmem:[%s6727_s1 + $0x5e8] ss:$16 sps:$4 sm:$0xff]   ;;  %v5036_v51 = vld [vmem:[%s6729_s3 + $0x14] ss:$8 sps:$4 sm:$0xff]  }
  0x9f   : > { %1964 = vmatpush1.bf16.msra.mxu0 %v4953_v6  ;;  %1904 = vmatprep.mubr.bf16.mxu0 %v474_v8  ;;  %v5001_v6 = vld [vmem:[%s6727_s1 + $0x580] ss:$16 sps:$4 sm:$0xff]  }
  0xa0   : > { %1965 = vmatprep.subr.bf16.mxu0 %v4961_v9  ;;  %v5009_v9 = vld [vmem:[%s6727_s1 + $0x5a4] ss:$16 sps:$4 sm:$0xff]   ;;  %v5031_v48 = vld [vmem:[%s6729_s3] ss:$8 sps:$4 sm:$0xff]  }
  0xa1   : > { %2410 = vmatpush1.bf16.msra.mxu1 %v4944_v3  ;;  %v446_v3 = vld [vmem:[%s5349_s17 + $0x360] sm:$0xff] }
  0xa2   : > { %2411 = vmatprep.subr.bf16.mxu1 %v4952_v4  ;;  %v4992_v4 = vld [vmem:[%s6727_s1 + $0x528] ss:$16 sps:$4 sm:$0xff]  }
  0xa3   : > { %1966 = vmatpush1.bf16.msra.mxu0 %v4959_v12  ;;  %v5006_v12 = vld [vmem:[%s6727_s1 + $0x56c] ss:$16 sps:$4 sm:$0xff]  }
  0xa4   : > { %2337 = vmatmul.mubr.bf16.gmra.mrb[36].mxu1 %v459_v53  ;;  %1967 = vmatprep.subr.bf16.mxu0 %v4967_v16  ;;  %v4988_v53 = vld [vmem:[%s6727_s1 + $0x50c] ss:$16 sps:$4 sm:$0xff]  }
  0xa5   : > { %2412 = vmatpush1.bf16.msra.mxu1 %v4950_v10  ;;  %2346 = vmatprep.mubr.bf16.mxu1 %v467_v57  ;;  %v4989_v57 = vld [vmem:[%s6727_s1 + $0x540] ss:$16 sps:$4 sm:$0xff]   ;;  %v4998_v10 = vld [vmem:[%s6727_s1 + $0x548] ss:$16 sps:$4 sm:$0xff]  }
  0xa6   : > { %2413 = vmatprep.subr.bf16.mxu1 %v4958_v11  ;;  %1905 = vmatmul.mubr.bf16.gmra.mrb[12].mxu0 %v473_v22  ;;  %v502_v11 = vpack.c.bf16 %v446_v3, %v439_v1  ;;  %v445_v16 = vld [vmem:[%s5349_s17 + $0x358] sm:$0xff] }
  0xa7   : > { %1968 = vmatpush1.bf16.msra.mxu0 %v4965_v24  ;;  %1914 = vmatprep.mubr.bf16.mxu0 %v481_v25  ;;  %v5013_v24 = vld [vmem:[%s6727_s1 + $0x5c0] ss:$16 sps:$4 sm:$0xff]  }
  0xa8   : > { %1969 = vmatprep.subr.bf16.mxu0 %v4973_v26  ;;  %v5021_v26 = vld [vmem:[%s6727_s1 + $0x5e4] ss:$16 sps:$4 sm:$0xff]   ;;  %v5040_v1 = vld [vmem:[%s6729_s3 + $0x30] ss:$8 sps:$4 sm:$0xff]  }
  0xa9   : > { %2414 = vmatpush1.bf16.msra.mxu1 %v4956_v19  ;;  %v350_v19 = vld [vmem:[%s5349_s17 + $0x60] sm:$0xff] }
  0xaa   : > { %2415 = vmatprep.subr.bf16.mxu1 %v4964_v21  ;;  %v5004_v21 = vld [vmem:[%s6727_s1 + $0x568] ss:$16 sps:$4 sm:$0xff]  }
  0xab   : > { %1970 = vmatpush1.bf16.msra.mxu0 %v4971_v29  ;;  %v5018_v29 = vld [vmem:[%s6727_s1 + $0x5ac] ss:$16 sps:$4 sm:$0xff]  }
  0xac   : > { %2347 = vmatmul.mubr.bf16.gmra.mrb[40].mxu1 %v466_v5  ;;  %1971 = vmatprep.subr.bf16.mxu0 %v4979_v32  ;;  %v5000_v5 = vld [vmem:[%s6727_s1 + $0x54c] ss:$16 sps:$4 sm:$0xff]  }
  0xad   : > { %2416 = vmatpush1.bf16.msra.mxu1 %v4962_v27  ;;  %2356 = vmatprep.mubr.bf16.mxu1 %v474_v8  ;;  %v494_v8 = vpack.c.bf16 %v431_v63, %v424_v62  ;;  %v5010_v27 = vld [vmem:[%s6727_s1 + $0x588] ss:$16 sps:$4 sm:$0xff]   ;;  %v392_v63 = vld [vmem:[%s5349_s17 + $0x1b0] sm:$0xff] }
  0xae   : > { %2417 = vmatprep.subr.bf16.mxu1 %v4970_v28  ;;  %1915 = vmatmul.mubr.bf16.gmra.mrb[16].mxu0 %v480_v39  ;;  %v455_v28 = vpack.c.bf16 %v350_v19, %v343_v18  ;;  %v349_v32 = vld [vmem:[%s5349_s17 + $0x58] sm:$0xff]  ;;  %v398_v18 = vld [vmem:[%s5349_s17 + $0x1e0] sm:$0xff] }
  0xaf   : > { %1972 = vmatpush1.bf16.msra.mxu0 %v4977_v40  ;;  %1924 = vmatprep.mubr.bf16.mxu0 %v488_v41  ;;  %v5022_v40 = vld [vmem:[%s6727_s1 + $0x5c8] ss:$16 sps:$4 sm:$0xff]  }
  0xb0   : > { %1973 = vmatprep.subr.bf16.mxu0 %v4985_v42  ;;  %v5027_v42 = vld [vmem:[%s6727_s1 + $0x5ec] ss:$16 sps:$4 sm:$0xff]  }
  0xb1   : > { %2418 = vmatpush1.bf16.msra.mxu1 %v4968_v36  ;;  %v5016_v36 = vld [vmem:[%s6727_s1 + $0x5a8] ss:$16 sps:$4 sm:$0xff]  }
  0xb2   : > { %2419 = vmatprep.subr.bf16.mxu1 %v4976_v37  ;;  %v5024_v37 = vld [vmem:[%s6727_s1 + $0x5cc] ss:$16 sps:$4 sm:$0xff]  }
  0xb3   : > { %1974 = vmatpush1.bf16.msra.mxu0 %v4983_v46  ;;  %v371_v46 = vld [vmem:[%s5349_s17 + $0x108] sm:$0xff]  ;;  %v385_v62 = vld [vmem:[%s5349_s17 + $0x178] sm:$0xff] }
  0xb4   : > { %2357 = vmatmul.mubr.bf16.gmra.mrb[44].mxu1 %v473_v22  ;;  %1975 = vmatprep.subr.bf16.mxu0 %v4991_v49  ;;  %v5012_v22 = vld [vmem:[%s6727_s1 + $0x58c] ss:$16 sps:$4 sm:$0xff]  }
  0xb5   : > { %2420 = vmatpush1.bf16.msra.mxu1 %v4974_v43  ;;  %2366 = vmatprep.mubr.bf16.mxu1 %v481_v25  ;;  %v501_v25 = vpack.c.bf16 %v445_v16, %v438_v15  ;;  %v356_v43 = vld [vmem:[%s5349_s17 + $0x90] sm:$0xff]  ;;  %v5033_v49 = vld [vmem:[%s6729_s3 + $0x4] ss:$8 sps:$4 sm:$0xff]   ;;  %v405_v19 = vld [vmem:[%s5349_s17 + $0x218] sm:$0xff] }
  0xb6   : > { %2421 = vmatprep.subr.bf16.mxu1 %v4982_v44  ;;  %1925 = vmatmul.mubr.bf16.gmra.mrb[20].mxu0 %v487_v54  ;;  %v363_v44 = vld [vmem:[%s5349_s17 + $0xc8] sm:$0xff]  ;;  %v5046_v16 = vld [vmem:[%s6729_s3 + $0x50] ss:$8 sps:$4 sm:$0xff]  }
  0xb7   : > { %1976 = vmatpush1.bf16.msra.mxu0 %v4989_v57  ;;  %1934 = vmatprep.mubr.bf16.mxu0 %v495_v59  ;;  %v5039_v57 = vld [vmem:[%s6729_s3 + $0x24] ss:$8 sps:$4 sm:$0xff]  }
  0xb8   : > { %1977 = vmatprep.subr.bf16.mxu0 %v4997_v58  ;;  %v5028_v58 = vld [vmem:[%s6727_s1 + $0x608] ss:$16 sps:$4 sm:$0xff]  }
  0xb9   : > { %2422 = vmatpush1.bf16.msra.mxu1 %v4980_v52  ;;  %v5030_v52 = vld [vmem:[%s6727_s1 + $0x60c] ss:$16 sps:$4 sm:$0xff]  }
  0xba   : > { %2423 = vmatprep.subr.bf16.mxu1 %v4988_v53  ;;  %v461_v53 = vpack.c.bf16 %v363_v44, %v356_v43 }
  0xbb   : > { %1978 = vmatpush1.bf16.msra.mxu0 %v4995_v61  ;;  %v5037_v61 = vld [vmem:[%s6729_s3 + $0x20] ss:$8 sps:$4 sm:$0xff]  }
  0xbc   : > { %2367 = vmatmul.mubr.bf16.gmra.mrb[48].mxu1 %v480_v39  ;;  %1979 = vmatprep.subr.bf16.mxu0 %v5003_v0  ;;  %v454_v39 = vpack.c.bf16 %v349_v32, %v342_v31  ;;  %v5042_v0 = vld [vmem:[%s6729_s3 + $0x34] ss:$8 sps:$4 sm:$0xff]   ;;  %v5057_v31 = vld [vmem:[%s6729_s3 + $0x84] ss:$8 sps:$4 sm:$0xff]  }
  0xbd   : > { %2424 = vmatpush1.bf16.msra.mxu1 %v4986_v55  ;;  %2376 = vmatprep.mubr.bf16.mxu1 %v488_v41  ;;  %v462_v41 = vpack.c.bf16 %v364_v35, %v357_v33  ;;  %v5034_v55 = vld [vmem:[%s6729_s3 + $0x10] ss:$8 sps:$4 sm:$0xff]  }
  0xbe   : > { %2425 = vmatprep.subr.bf16.mxu1 %v4994_v60  ;;  %1935 = vmatmul.mubr.bf16.gmra.mrb[24].mxu0 %v494_v8  ;;  %v377_v60 = vld [vmem:[%s5349_s17 + $0x138] sm:$0xff]  ;;  %v412_v35 = vld [vmem:[%s5349_s17 + $0x250] sm:$0xff] }
  0xbf   : > { %1980 = vmatpush1.bf16.msra.mxu0 %v5001_v6  ;;  %1944 = vmatprep.mubr.bf16.mxu0 %v502_v11  ;;  %v384_v6 = vld [vmem:[%s5349_s17 + $0x170] sm:$0xff] }
  0xc0   : > { %1981 = vmatprep.subr.bf16.mxu0 %v5009_v9  ;;  %v5043_v9 = vld [vmem:[%s6729_s3 + $0x40] ss:$8 sps:$4 sm:$0xff]  }
  0xc1   : > { %2426 = vmatpush1.bf16.msra.mxu1 %v4992_v4  ;;  %v476_v4 = vpack.c.bf16 %v392_v63, %v385_v62  ;;  %v5069_v63 = vld [vmem:[%s6729_s3 + $0xc4] ss:$8 sps:$4 sm:$0xff]  }
  0xc2   : > { %2427 = vmatprep.subr.bf16.mxu1 %v5000_v5  ;;  %v5045_v5 = vld [vmem:[%s6729_s3 + $0x44] ss:$8 sps:$4 sm:$0xff]  }
  0xc3   : > { %1982 = vmatpush1.bf16.msra.mxu0 %v5007_v13 }
  0xc4   : > { %2377 = vmatmul.mubr.bf16.gmra.mrb[52].mxu1 %v487_v54  ;;  %1983 = vmatprep.subr.bf16.mxu0 %v5015_v17  ;;  %v469_v54 = vpack.c.bf16 %v378_v47, %v371_v46  ;;  %v5051_v17 = vld [vmem:[%s6729_s3 + $0x64] ss:$8 sps:$4 sm:$0xff]   ;;  %v5058_v46 = vld [vmem:[%s6729_s3 + $0x90] ss:$8 sps:$4 sm:$0xff]  }
  0xc5   : > { %2428 = vmatpush1.bf16.msra.mxu1 %v4998_v10  ;;  %2386 = vmatprep.mubr.bf16.mxu1 %v495_v59  ;;  %v370_v59 = vld [vmem:[%s5349_s17 + $0x100] sm:$0xff]  ;;  %v399_v10 = vld [vmem:[%s5349_s17 + $0x1e8] sm:$0xff] }
  0xc6   : > { %2429 = vmatprep.subr.bf16.mxu1 %v5006_v12  ;;  %1945 = vmatmul.mubr.bf16.gmra.mrb[28].mxu0 %v501_v25  ;;  %v468_v3 = vpack.c.bf16 %v377_v60, %v370_v59  ;;  %v5048_v12 = vld [vmem:[%s6729_s3 + $0x54] ss:$8 sps:$4 sm:$0xff]  }
  0xc7   : > { %1984 = vmatpush1.bf16.msra.mxu0 %v5013_v24  ;;  %1987 = vmatprep.mubr.bf16.mxu0 %v455_v28  ;;  %v420_v24 = vld [vmem:[%s5349_s17 + $0x290] sm:$0xff] }
  0xc8   : > { %1985 = vmatprep.subr.bf16.mxu0 %v5021_v26  ;;  %v482_v26 = vpack.c.bf16 %v405_v19, %v398_v18 }
  0xc9   : > { %2430 = vmatpush1.bf16.msra.mxu1 %v5004_v21  ;;  %v5049_v21 = vld [vmem:[%s6729_s3 + $0x60] ss:$8 sps:$4 sm:$0xff]  }
  0xca   : > { %2431 = vmatprep.subr.bf16.mxu1 %v5012_v22  ;;  %v413_v22 = vld [vmem:[%s5349_s17 + $0x258] sm:$0xff] }
  0xcb   : > { %1986 = vmatpush1.bf16.msra.mxu0 %v5019_v30 }
  0xcc   : > { %2387 = vmatmul.mubr.bf16.gmra.mrb[56].mxu1 %v494_v8  ;;  %3125 = vmatprep.subr.bf16.mxu0 %v5033_v49  ;;  %v391_v8 = vld [vmem:[%s5349_s17 + $0x1a8] sm:$0xff] }
  0xcd   : > { %2432 = vmatpush1.bf16.msra.mxu1 %v5010_v27  ;;  %2396 = vmatprep.mubr.bf16.mxu1 %v502_v11  ;;  %v406_v11 = vld [vmem:[%s5349_s17 + $0x220] sm:$0xff]  ;;  %v475_v13 = vpack.c.bf16 %v391_v8, %v384_v6 }
  0xce   : > { %2433 = vmatprep.subr.bf16.mxu1 %v5018_v29  ;;  %1988 = vmatmul.mubr.bf16.vlgmr.msra.gmra.mrb[0].mxu0 %v454_v39  ;;  %v483_v15 = vpack.c.bf16 %v406_v11, %v399_v10  ;;  %v5052_v29 = vld [vmem:[%s6729_s3 + $0x70] ss:$8 sps:$4 sm:$0xff]  }
  0xcf   : > { %1997 = vmatprep.mubr.bf16.mxu0 %v462_v41  ;;  %3126 = vmatpush1.bf16.msra.mxu0 %v5031_v48  ;;  %v5063_v48 = vld [vmem:[%s6729_s3 + $0xa4] ss:$8 sps:$4 sm:$0xff]  }
  0xd0   : > { %3127 = vmatprep.subr.bf16.mxu0 %v5036_v51  ;;  %v426_v51 = vld [vmem:[%s5349_s17 + $0x2c0] sm:$0xff] }
  0xd1   : > { %2434 = vmatpush1.bf16.msra.mxu1 %v5016_v36  ;;  %v419_v36 = vld [vmem:[%s5349_s17 + $0x288] sm:$0xff] }
  0xd2   : > { %2435 = vmatprep.subr.bf16.mxu1 %v5024_v37  ;;  %v5055_v37 = vld [vmem:[%s6729_s3 + $0x80] ss:$8 sps:$4 sm:$0xff]  }
  0xd3   : > { %3128 = vmatpush1.bf16.msra.mxu0 %v5034_v55  ;;  %v448_v55 = vld [vmem:[%s5349_s17 + $0x370] sm:$0xff] }
  0xd4   : > { %2397 = vmatmul.mubr.bf16.gmra.mrb[60].mxu1 %v501_v25  ;;  %3129 = vmatprep.subr.bf16.mxu0 %v5039_v57  ;;  %v5054_v25 = vld [vmem:[%s6729_s3 + $0x74] ss:$8 sps:$4 sm:$0xff]  }
  0xd5   : > { %2436 = vmatpush1.bf16.msra.mxu1 %v5022_v40  ;;  %2439 = vmatprep.mubr.bf16.mxu1 %v455_v28  ;;  %v490_v28 = vpack.c.bf16 %v420_v24, %v413_v22  ;;  %v434_v40 = vld [vmem:[%s5349_s17 + $0x300] sm:$0xff]  ;;  %v5066_v57 = vld [vmem:[%s6729_s3 + $0xb4] ss:$8 sps:$4 sm:$0xff]  }
  0xd6   : > { %2437 = vmatprep.subr.bf16.mxu1 %v5027_v42  ;;  %1998 = vmatmul.mubr.bf16.gmra.mrb[4].mxu0 %v461_v53  ;;  %v489_v42 = vpack.c.bf16 %v419_v36, %v412_v35 }
  0xd7   : > { %2007 = vmatprep.mubr.bf16.mxu0 %v469_v54  ;;  %3130 = vmatpush1.bf16.msra.mxu0 %v5037_v61  ;;  %v5064_v61 = vld [vmem:[%s6729_s3 + $0xb0] ss:$8 sps:$4 sm:$0xff]  }
  0xd8   : > { %3131 = vmatprep.subr.bf16.mxu0 %v5042_v0 }
  0xd9   : > { %2438 = vmatpush1.bf16.msra.mxu1 %v5025_v50 }
  0xda   : > { %2520 = vmatprep.subr.bf16.mxu1 %v5030_v52  ;;  %v433_v52 = vld [vmem:[%s5349_s17 + $0x2f8] sm:$0xff] }
  0xdb   : > { %3132 = vmatpush1.bf16.msra.mxu0 %v5040_v1 }
  0xdc   : > { %2440 = vmatmul.mubr.bf16.vlgmr.msra.gmra.mrb[32].mxu1 %v454_v39  ;;  %3133 = vmatprep.subr.bf16.mxu0 %v5045_v5  ;;  %v427_v39 = vld [vmem:[%s5349_s17 + $0x2c8] sm:$0xff] }
  0xdd   : > { %2521 = vmatpush1.bf16.msra.mxu1 %v5028_v58  ;;  %2449 = vmatprep.mubr.bf16.mxu1 %v462_v41  ;;  %v5060_v41 = vld [vmem:[%s6729_s3 + $0x94] ss:$8 sps:$4 sm:$0xff]   ;;  %v497_v44 = vpack.c.bf16 %v434_v40, %v427_v39  ;;  %v496_v58 = vpack.c.bf16 %v433_v52, %v426_v51  ;;  %v5067_v5 = vld [vmem:[%s6729_s3 + $0xc0] ss:$8 sps:$4 sm:$0xff]   ;;  %v5076_v40 = vld [vmem:[%s6729_s3 + $0xf0] ss:$8 sps:$4 sm:$0xff]  }
  0xde   : > { %2008 = vmatmul.mubr.bf16.gmra.mrb[8].mxu0 %v468_v3  ;;  %v5078_v39 = vld [vmem:[%s6729_s3 + $0xf4] ss:$8 sps:$4 sm:$0xff]  }
  0xdf   : > { %2017 = vmatprep.mubr.bf16.mxu0 %v476_v4  ;;  %3134 = vmatpush1.bf16.msra.mxu0 %v5043_v9 }
  0xe0   : > { %3135 = vmatprep.subr.bf16.mxu0 %v5048_v12 }
  0xe3   : > { %3136 = vmatpush1.bf16.msra.mxu0 %v5046_v16 }
  0xe4   : > { %2450 = vmatmul.mubr.bf16.gmra.mrb[36].mxu1 %v461_v53  ;;  %3137 = vmatprep.subr.bf16.mxu0 %v5051_v17  ;;  %v5061_v53 = vld [vmem:[%s6729_s3 + $0xa0] ss:$8 sps:$4 sm:$0xff]  }
  0xe5   : > { %2459 = vmatprep.mubr.bf16.mxu1 %v469_v54  ;;  %v441_v54 = vld [vmem:[%s5349_s17 + $0x338] sm:$0xff] }
  0xe6   : > { %2018 = vmatmul.mubr.bf16.gmra.mrb[12].mxu0 %v475_v13  ;;  %v504_v60 = vpack.c.bf16 %v448_v55, %v441_v54 }
  0xe7   : > { %2027 = vmatprep.mubr.bf16.mxu0 %v483_v15  ;;  %3138 = vmatpush1.bf16.msra.mxu0 %v5049_v21 }
  0xe8   : > { %3139 = vmatprep.subr.bf16.mxu0 %v5054_v25 }
  0xeb   : > { %3140 = vmatpush1.bf16.msra.mxu0 %v5052_v29 }
  0xec   : > { %2460 = vmatmul.mubr.bf16.gmra.mrb[40].mxu1 %v468_v3  ;;  %3141 = vmatprep.subr.bf16.mxu0 %v5057_v31  ;;  %v440_v3 = vld [vmem:[%s5349_s17 + $0x330] sm:$0xff] }
  0xed   : > { %2469 = vmatprep.mubr.bf16.mxu1 %v476_v4  ;;  %v447_v4 = vld [vmem:[%s5349_s17 + $0x368] sm:$0xff]  ;;  %s5157_s17 = scalar_lea.vmem %s5156_s28, 4096 }
  0xee   : > { %2028 = vmatmul.mubr.bf16.gmra.mrb[16].mxu0 %v482_v26  ;;  %v503_v6 = vpack.c.bf16 %v447_v4, %v440_v3  ;;  %p5159_p1 = scmp.lt.s32.totalorder %s5157_s17, %s5151_s25 }
  0xef   : > { %v6102_v27 = vpop.f32.mrb[0].mxu1  ;;  %2037 = vmatprep.mubr.bf16.mxu0 %v490_v28  ;;  %3142 = vmatpush1.bf16.msra.mxu0 %v5055_v37  ;;  %v5073_v37 = vld [vmem:[%s6729_s3 + $0xe0] ss:$8 sps:$4 sm:$0xff]  }
  0xf0   : > { %v6107_v30 = vpop.f32.mrb[1].mxu1  ;;  %3143 = vmatprep.subr.bf16.mxu0 %v5060_v41  ;;  %p5160_p2 = por %p5159_p1, %p5158_p0 }
  0xf1   : > { %v6112_v32 = vpop.f32.mrb[2].mxu1 }
  0xf2   : > { %v6114_v33 = vpop.f32.mrb[3].mxu1  ;;  %p5161_p3 = pnand %p5160_p2, %p5154_p13 }
  0xf3   : > { %3144 = vmatpush1.bf16.msra.mxu0 %v5058_v46 }
  0xf4   : > { %2470 = vmatmul.mubr.bf16.gmra.mrb[44].mxu1 %v475_v13  ;;  %3145 = vmatprep.subr.bf16.mxu0 %v5063_v48 }
  0xf5   : > { %2479 = vmatprep.mubr.bf16.mxu1 %v483_v15 }
  0xf6   : > { %2038 = vmatmul.mubr.bf16.gmra.mrb[20].mxu0 %v489_v42 }
  0xf7   : > { %v6126_v43 = vpop.f32.mrb[4].mxu1  ;;  %2047 = vmatprep.mubr.bf16.mxu0 %v497_v44  ;;  %3146 = vmatpush1.bf16.msra.mxu0 %v5061_v53 }
  0xf8   : > { %v6131_v47 = vpop.f32.mrb[5].mxu1  ;;  %3147 = vmatprep.subr.bf16.mxu0 %v5066_v57 }
  0xf9   : > { %v6136_v49 = vpop.f32.mrb[6].mxu1 }
  0xfa   : > { %v6138_v50 = vpop.f32.mrb[7].mxu1 }
  0xfb   : > { %3148 = vmatpush1.bf16.msra.mxu0 %v5064_v61 }
  0xfc   : > { %2480 = vmatmul.mubr.bf16.gmra.mrb[48].mxu1 %v482_v26  ;;  %3149 = vmatprep.subr.bf16.mxu0 %v5069_v63 }
  0xfd   : > { %2489 = vmatprep.mubr.bf16.mxu1 %v490_v28  ;;  %v5072_v28 = vld [vmem:[%s6729_s3 + $0xd4] ss:$8 sps:$4 sm:$0xff]  }
  0xfe   : > { %2048 = vmatmul.mubr.bf16.gmra.mrb[24].mxu0 %v496_v58 }
  0xff   : > { %v6150_v59 = vpop.f32.mrb[8].mxu1  ;;  %2057 = vmatprep.mubr.bf16.mxu0 %v504_v60  ;;  %3150 = vmatpush1.bf16.msra.mxu0 %v5067_v5 }
 0x100   : > { %v6155_v62 = vpop.f32.mrb[9].mxu1  ;;  %3151 = vmatprep.subr.bf16.mxu0 %v5072_v28 }
 0x101   : > { %v6160_v0 = vpop.f32.mrb[10].mxu1 }
 0x102   : > { %v6162_v1 = vpop.f32.mrb[11].mxu1 }
 0x104   : > { %2490 = vmatmul.mubr.bf16.gmra.mrb[52].mxu1 %v489_v42  ;;  %v6260_v42 = vld [vmem:[%s6728_s2] sm:$0xf] }
 0x105   : > { %2499 = vmatprep.mubr.bf16.mxu1 %v497_v44 }
 0x106   : > { %2058 = vmatmul.mubr.bf16.gmra.mrb[28].mxu0 %v503_v6 }
 0x107   : > { %v6169_v8 = vpop.f32.mrb[12].mxu1 }
 0x108   : > { %v6171_v9 = vpop.f32.mrb[13].mxu1 }
 0x109   : > { %v6173_v10 = vpop.f32.mrb[14].mxu1 }
 0x10a   : > { %v6175_v11 = vpop.f32.mrb[15].mxu1 }
 0x10c   : > { %2500 = vmatmul.mubr.bf16.gmra.mrb[56].mxu1 %v496_v58 }
 0x10d   : > { %2509 = vmatprep.mubr.bf16.mxu1 %v504_v60 }
 0x10f   : > { %v6177_v12 = vpop.f32.mrb[16].mxu1 }
 0x110   : > { %v6179_v13 = vpop.f32.mrb[17].mxu1 }
 0x111   : > { %v6181_v15 = vpop.f32.mrb[18].mxu1 }
 0x112   : > { %v6183_v16 = vpop.f32.mrb[19].mxu1 }
 0x114   : > { %2510 = vmatmul.mubr.bf16.gmra.mrb[60].mxu1 %v503_v6 }
 0x115   : > { %2552 = vmatprep.mubr.bf16.mxu1 %v5215_v2 }
 0x117   : > { %v6186_v17 = vpop.f32.mrb[20].mxu1 }
 0x118   : > { %v6188_v18 = vpop.f32.mrb[21].mxu1 }
 0x119   : > { %v6190_v19 = vpop.f32.mrb[22].mxu1 }
 0x11a   : > { %v6192_v21 = vpop.f32.mrb[23].mxu1 }
 0x11c   : > { %4142 = vmatmul.mubr.msk.bf16.vlgmr.msra.gmra.mrb[32].mxu1 %vm1704_vm0, %v5359_v14  ;;  %v5070_v14 = vld [vmem:[%s6729_s3 + $0xd0] ss:$8 sps:$4 sm:$0xff]  }
 0x11d   : > { %2562 = vmatprep.mubr.bf16.mxu1 %v5215_v2  ;;  %3152 = vmatpush1.bf16.msra.mxu0 %v5070_v14 }
 0x11f   : > { %v6197_v22 = vpop.f32.mrb[24].mxu1 }
 0x120   : > { %v6199_v24 = vpop.f32.mrb[25].mxu1 }
 0x121   : > { %v6201_v25 = vpop.f32.mrb[26].mxu1 }
 0x122   : > { %v6203_v26 = vpop.f32.mrb[27].mxu1 }
 0x124   : > { %4143 = vmatmul.mubr.msk.bf16.gmra.mrb[36].mxu1 %vm1704_vm0, %v5384_v23  ;;  %v5075_v23 = vld [vmem:[%s6729_s3 + $0xe4] ss:$8 sps:$4 sm:$0xff]  }
 0x125   : > { %2572 = vmatprep.mubr.bf16.mxu1 %v5215_v2  ;;  %3153 = vmatprep.subr.bf16.mxu0 %v5075_v23 }
 0x126   : > { %3154 = vmatpush1.bf16.msra.mxu0 %v5073_v37 }
 0x127   : > { %v6214_v29 = vpop.f32.mrb[28].mxu1  ;;  %3155 = vmatprep.subr.bf16.mxu0 %v5078_v39 }
 0x128   : > { %v6216_v31 = vpop.f32.mrb[29].mxu1 }
 0x129   : > { %v6218_v35 = vpop.f32.mrb[30].mxu1 }
 0x12a   : > { %v6223_v36 = vpop.f32.mrb[31].mxu1  ;;  %3156 = vmatpush1.bf16.msra.mxu0 %v5076_v40  ;;  %v5084_v40 = vld [vmem:[%s6729_s3 + $0x114] ss:$8 sps:$4 sm:$0xff]  }
 0x12c   : > { %4144 = vmatmul.mubr.msk.bf16.gmra.mrb[40].mxu1 %vm1704_vm0, %v5415_v34  ;;  %v5081_v34 = vld [vmem:[%s6729_s3 + $0x104] ss:$8 sps:$4 sm:$0xff]  }
 0x12d   : > { %2582 = vmatprep.mubr.bf16.mxu1 %v5215_v2  ;;  %3238 = vmatprep.subr.bf16.mxu0 %v5081_v34 }
 0x134   : > { %4145 = vmatmul.mubr.msk.bf16.gmra.mrb[44].mxu1 %vm1704_vm0, %v5446_v45  ;;  %v704_v45 = vlaneseq }
 0x135   : > { %2592 = vmatprep.mubr.bf16.mxu1 %v5215_v2 }
 0x136   : > { %v6254_v41 = vshrl.u32 %v704_v45, 7 }
 0x13c   : > { %4146 = vmatmul.mubr.msk.bf16.gmra.mrb[48].mxu1 %vm1704_vm0, %v5477_v56  ;;  %v706_v56 = vsub.s32 0, %v6254_v41 }
 0x13d   : > { %2602 = vmatprep.mubr.bf16.mxu1 %v5215_v2 }
 0x144   : > { %4147 = vmatmul.mubr.msk.bf16.gmra.mrb[52].mxu1 %vm1704_vm0, %v5512_v7  ;;  %v710_v7 = vsub.s32 1, %v6254_v41 }
 0x145   : > { %2612 = vmatprep.mubr.bf16.mxu1 %v5215_v2 }
 0x14c   : > { %4148 = vmatmul.mubr.msk.bf16.gmra.mrb[56].mxu1 %vm1704_vm0, %v5547_v20  ;;  %v6266_v20 = vrot.slane %v6260_v42, %v706_v56 }
 0x14d   : > { %2622 = vmatprep.mubr.bf16.mxu1 %v5215_v2  ;;  %v6271_v2 = vrot.slane %v6260_v42, %v710_v7 }
 0x154   : > { %4149 = vmatmul.mubr.msk.bf16.gmra.mrb[60].mxu1 %vm1704_vm0, %v5579_v38 }
 0x1a1   : > { %v1989_v38 = vpop.f32.mrb[0].mxu0 }
 0x1a2   : > { %v4374_v44 = vadd.f32 %v1989_v38, %v6266_v20  ;;  %v1991_v46 = vpop.f32.mrb[1].mxu0 }
 0x1a3   : > { %v4376_v48 = vadd.f32 %v1991_v46, %v6271_v2  ;;  %v1993_v51 = vpop.f32.mrb[2].mxu0  ;;  %v5082_v46 = vld [vmem:[%s6729_s3 + $0x110] ss:$8 sps:$4 sm:$0xff]  }
 0x1a4   : > { %v4375_v52 = vadd.f32 %v4374_v44, %v6102_v27  ;;  %v4378_v53 = vadd.f32 %v1993_v51, %v6266_v20  ;;  %v1995_v54 = vpop.f32.mrb[3].mxu0  ;;  %v6297_v44 = vld [vmem:[%s6731_s5 + $0x40] sm:$0xff]  }
 0x1a5   : > { %v4377_v55 = vadd.f32 %v4376_v48, %v6107_v30  ;;  %v4380_v57 = vadd.f32 %v1995_v54, %v6271_v2  ;;  %v5079_v30 = vld [vmem:[%s6729_s3 + $0x100] ss:$8 sps:$4 sm:$0xff]   ;;  %v5087_v51 = vld [vmem:[%s6729_s3 + $0x124] ss:$8 sps:$4 sm:$0xff]   ;;  %4358 = vmatprep.subr.bf16.mxu1 %v6297_v44 }
 0x1a6   : > { %v4379_v58 = vadd.f32 %v4378_v53, %v6112_v32  ;;  %v2633_v61 = vmax.f32 %v4375_v52, 0.0 }
 0x1a7   : > { %v4381_v60 = vadd.f32 %v4380_v57, %v6114_v33  ;;  %v2634_v3 = vmax.f32 %v4377_v55, 0.0 }
 0x1a8   : > { %v2637_v63 = vmax.f32 %v4379_v58, 0.0 }
 0x1a9   : > { %v2638_v4 = vmax.f32 %v4381_v60, 0.0  ;;  %v1999_v5 = vpop.f32.mrb[4].mxu0 }
 0x1aa   : > { %v2697_v6 = vpack.c.bf16 %v2637_v63, %v2633_v61  ;;  %v4382_v28 = vadd.f32 %v1999_v5, %v6266_v20  ;;  %v2001_v27 = vpop.f32.mrb[5].mxu0 }
 0x1ab   : > { %v4384_v14 = vadd.f32 %v2001_v27, %v6271_v2  ;;  %v2003_v23 = vpop.f32.mrb[6].mxu0  ;;  %v2698_v37 = vpack.c.bf16 %v2638_v4, %v2634_v3  ;;  %v5085_v3 = vld [vmem:[%s6729_s3 + $0x120] ss:$8 sps:$4 sm:$0xff]   ;;  %v5090_v27 = vld [vmem:[%s6729_s3 + $0x134] ss:$8 sps:$4 sm:$0xff]  }
 0x1ac   : > { %v4383_v32 = vadd.f32 %v4382_v28, %v6126_v43  ;;  %v4386_v33 = vadd.f32 %v2003_v23, %v6266_v20  ;;  %v2005_v39 = vpop.f32.mrb[7].mxu0  ;;  %v6327_v4 = vld [vmem:[%s6731_s5 + $0x8] sm:$0xff]  }
 0x1ad   : > { %v4385_v34 = vadd.f32 %v4384_v14, %v6131_v47  ;;  %v4388_v45 = vadd.f32 %v2005_v39, %v6271_v2  ;;  %3157 = vmatprep.mubr.bf16.mxu0 %v2698_v37  ;;  %v6306_v47 = vld [vmem:[%s6731_s5] sm:$0xff]   ;;  %v6337_v14 = vld [vmem:[%s6731_s5 + $0x50] sm:$0xff]  }
 0x1ae   : > { %v4387_v38 = vadd.f32 %v4386_v33, %v6136_v49  ;;  %3158 = vmatmul.mubr.bf16.vlgmr.msra.gmra.mrb[32].mxu0 %v2697_v6  ;;  %v2641_v48 = vmax.f32 %v4383_v32, 0.0  ;;  %4366 = vmatpush3.bf16.msra.mxu1 %v6306_v47  ;;  %v5088_v32 = vld [vmem:[%s6729_s3 + $0x130] ss:$8 sps:$4 sm:$0xff]  }
 0x1af   : > { %v4389_v43 = vadd.f32 %v4388_v45, %v6138_v50  ;;  %3239 = vmatpush1.bf16.msra.mxu0 %v5079_v30  ;;  %v6315_v50 = vld [vmem:[%s6731_s5 + $0x48] sm:$0xff]   ;;  %v2642_v52 = vmax.f32 %v4385_v34, 0.0 }
 0x1b0   : > { %v2645_v49 = vmax.f32 %v4387_v38, 0.0  ;;  %3240 = vmatprep.subr.bf16.mxu0 %v5084_v40  ;;  %4359 = vmatprep.subr.bf16.mxu1 %v6315_v50 }
 0x1b1   : > { %v2646_v53 = vmax.f32 %v4389_v43, 0.0  ;;  %v2009_v54 = vpop.f32.mrb[8].mxu0 }
 0x1b2   : > { %v4390_v55 = vadd.f32 %v2009_v54, %v6266_v20  ;;  %v2011_v57 = vpop.f32.mrb[9].mxu0  ;;  %v2701_v58 = vpack.c.bf16 %v2645_v49, %v2641_v48  ;;  %4367 = vmatpush3.bf16.msra.mxu1 %v6327_v4 }
 0x1b3   : > { %v4392_v60 = vadd.f32 %v2011_v57, %v6271_v2  ;;  %v2013_v61 = vpop.f32.mrb[10].mxu0  ;;  %v2702_v63 = vpack.c.bf16 %v2646_v53, %v2642_v52  ;;  %3241 = vmatpush1.bf16.msra.mxu0 %v5082_v46  ;;  %4360 = vmatprep.subr.bf16.mxu1 %v6337_v14  ;;  %v5091_v52 = vld [vmem:[%s6729_s3 + $0x140] ss:$8 sps:$4 sm:$0xff]   ;;  %v6371_v53 = vld [vmem:[%s6731_s5 + $0x18] sm:$0xff]  }
 0x1b4   : > { %v4391_v5 = vadd.f32 %v4390_v55, %v6150_v59  ;;  %v4394_v6 = vadd.f32 %v2013_v61, %v6266_v20  ;;  %v2015_v28 = vpop.f32.mrb[11].mxu0  ;;  %3242 = vmatprep.subr.bf16.mxu0 %v5087_v51 }
 0x1b5   : > { %v4393_v23 = vadd.f32 %v4392_v60, %v6155_v62  ;;  %v4396_v37 = vadd.f32 %v2015_v28, %v6271_v2  ;;  %3167 = vmatprep.mubr.bf16.mxu0 %v2702_v63  ;;  %v6351_v62 = vld [vmem:[%s6731_s5 + $0x10] sm:$0xff]   ;;  %v6381_v60 = vld [vmem:[%s6731_s5 + $0x60] sm:$0xff]  }
 0x1b6   : > { %v4395_v59 = vadd.f32 %v4394_v6, %v6160_v0  ;;  %3168 = vmatmul.mubr.bf16.gmra.mrb[36].mxu0 %v2701_v58  ;;  %v2649_v33 = vmax.f32 %v4391_v5, 0.0  ;;  %v5093_v0 = vld [vmem:[%s6729_s3 + $0x144] ss:$8 sps:$4 sm:$0xff]   ;;  %4368 = vmatpush3.bf16.msra.mxu1 %v6351_v62  ;;  %v5096_v58 = vld [vmem:[%s6729_s3 + $0x154] ss:$8 sps:$4 sm:$0xff]  }
 0x1b7   : > { %v4397_v30 = vadd.f32 %v4396_v37, %v6162_v1  ;;  %3243 = vmatpush1.bf16.msra.mxu0 %v5085_v3  ;;  %v6359_v1 = vld [vmem:[%s6731_s5 + $0x58] sm:$0xff]   ;;  %v2650_v40 = vmax.f32 %v4393_v23, 0.0 }
 0x1b8   : > { %v2653_v39 = vmax.f32 %v4395_v59, 0.0  ;;  %3244 = vmatprep.subr.bf16.mxu0 %v5090_v27  ;;  %4361 = vmatprep.subr.bf16.mxu1 %v6359_v1  ;;  %v5094_v5 = vld [vmem:[%s6729_s3 + $0x150] ss:$8 sps:$4 sm:$0xff]  }
 0x1b9   : > { %v2654_v34 = vmax.f32 %v4397_v30, 0.0  ;;  %v2019_v45 = vpop.f32.mrb[12].mxu0 }
 0x1ba   : > { %v4398_v38 = vadd.f32 %v2019_v45, %v6266_v20  ;;  %v2021_v43 = vpop.f32.mrb[13].mxu0  ;;  %v2705_v46 = vpack.c.bf16 %v2653_v39, %v2649_v33  ;;  %4369 = vmatpush3.bf16.msra.mxu1 %v6371_v53 }
 0x1bb   : > { %v4400_v48 = vadd.f32 %v2021_v43, %v6271_v2  ;;  %v2023_v49 = vpop.f32.mrb[14].mxu0  ;;  %v2706_v51 = vpack.c.bf16 %v2654_v34, %v2650_v40  ;;  %3245 = vmatpush1.bf16.msra.mxu0 %v5088_v32  ;;  %4362 = vmatprep.subr.bf16.mxu1 %v6381_v60  ;;  %v5097_v40 = vld [vmem:[%s6729_s3 + $0x160] ss:$8 sps:$4 sm:$0xff]   ;;  %v5102_v43 = vld [vmem:[%s6729_s3 + $0x174] ss:$8 sps:$4 sm:$0xff]  }
 0x1bc   : > { %v4399_v54 = vadd.f32 %v4398_v38, %v6169_v8  ;;  %v4402_v55 = vadd.f32 %v2023_v49, %v6266_v20  ;;  %v2025_v57 = vpop.f32.mrb[15].mxu0  ;;  %3246 = vmatprep.subr.bf16.mxu0 %v5093_v0 }
 0x1bd   : > { %v4401_v61 = vadd.f32 %v4400_v48, %v6171_v9  ;;  %v4404_v63 = vadd.f32 %v2025_v57, %v6271_v2  ;;  %3177 = vmatprep.mubr.bf16.mxu0 %v2706_v51  ;;  %v6395_v9 = vld [vmem:[%s6731_s5 + $0x20] sm:$0xff]  }
 0x1be   : > { %v4403_v8 = vadd.f32 %v4402_v55, %v6173_v10  ;;  %3178 = vmatmul.mubr.bf16.gmra.mrb[40].mxu0 %v2705_v46  ;;  %v2657_v6 = vmax.f32 %v4399_v54, 0.0  ;;  %v5099_v10 = vld [vmem:[%s6729_s3 + $0x164] ss:$8 sps:$4 sm:$0xff]   ;;  %4370 = vmatpush3.bf16.msra.mxu1 %v6395_v9 }
 0x1bf   : > { %v4405_v3 = vadd.f32 %v4404_v63, %v6175_v11  ;;  %3247 = vmatpush1.bf16.msra.mxu0 %v5091_v52  ;;  %v6403_v11 = vld [vmem:[%s6731_s5 + $0x68] sm:$0xff]   ;;  %v2658_v27 = vmax.f32 %v4401_v61, 0.0 }
 0x1c0   : > { %v2661_v28 = vmax.f32 %v4403_v8, 0.0  ;;  %3248 = vmatprep.subr.bf16.mxu0 %v5096_v58  ;;  %4363 = vmatprep.subr.bf16.mxu1 %v6403_v11 }
 0x1c1   : > { %v2662_v23 = vmax.f32 %v4405_v3, 0.0  ;;  %v2029_v37 = vpop.f32.mrb[16].mxu0 }
 0x1c2   : > { %v4406_v59 = vadd.f32 %v2029_v37, %v6266_v20  ;;  %v2031_v30 = vpop.f32.mrb[17].mxu0  ;;  %v2709_v32 = vpack.c.bf16 %v2661_v28, %v2657_v6 }
 0x1c3   : > { %v4408_v33 = vadd.f32 %v2031_v30, %v6271_v2  ;;  %v2033_v39 = vpop.f32.mrb[18].mxu0  ;;  %v2710_v0 = vpack.c.bf16 %v2662_v23, %v2658_v27  ;;  %3249 = vmatpush1.bf16.msra.mxu0 %v5094_v5  ;;  %v5103_v5 = vld [vmem:[%s6729_s3 + $0x180] ss:$8 sps:$4 sm:$0xff]   ;;  %v5108_v27 = vld [vmem:[%s6729_s3 + $0x194] ss:$8 sps:$4 sm:$0xff]  }
 0x1c4   : > { %v4407_v34 = vadd.f32 %v4406_v59, %v6177_v12  ;;  %v4410_v45 = vadd.f32 %v2033_v39, %v6266_v20  ;;  %v2035_v38 = vpop.f32.mrb[19].mxu0  ;;  %3250 = vmatprep.subr.bf16.mxu0 %v5099_v10  ;;  %v5100_v12 = vld [vmem:[%s6729_s3 + $0x170] ss:$8 sps:$4 sm:$0xff]  }
 0x1c5   : > { %v4409_v46 = vadd.f32 %v4408_v33, %v6179_v13  ;;  %v4412_v48 = vadd.f32 %v2035_v38, %v6271_v2  ;;  %3187 = vmatprep.mubr.bf16.mxu0 %v2710_v0  ;;  %v5105_v13 = vld [vmem:[%s6729_s3 + $0x184] ss:$8 sps:$4 sm:$0xff]  }
 0x1c6   : > { %v4411_v49 = vadd.f32 %v4410_v45, %v6181_v15  ;;  %3188 = vmatmul.mubr.bf16.gmra.mrb[44].mxu0 %v2709_v32  ;;  %v2665_v52 = vmax.f32 %v4407_v34, 0.0 }
 0x1c7   : > { %v4413_v51 = vadd.f32 %v4412_v48, %v6183_v16  ;;  %3251 = vmatpush1.bf16.msra.mxu0 %v5097_v40  ;;  %v2666_v55 = vmax.f32 %v4409_v46, 0.0  ;;  %v5109_v46 = vld [vmem:[%s6729_s3 + $0x1a0] ss:$8 sps:$4 sm:$0xff]  }
 0x1c8   : > { %v2669_v54 = vmax.f32 %v4411_v49, 0.0  ;;  %3252 = vmatprep.subr.bf16.mxu0 %v5102_v43 }
 0x1c9   : > { %v2670_v57 = vmax.f32 %v4413_v51, 0.0  ;;  %v2039_v58 = vpop.f32.mrb[20].mxu0 }
 0x1ca   : > { %v4414_v15 = vadd.f32 %v2039_v58, %v6266_v20  ;;  %v2041_v61 = vpop.f32.mrb[21].mxu0  ;;  %v2713_v63 = vpack.c.bf16 %v2669_v54, %v2665_v52 }
 0x1cb   : > { %v4416_v16 = vadd.f32 %v2041_v61, %v6271_v2  ;;  %v2043_v8 = vpop.f32.mrb[22].mxu0  ;;  %v2714_v3 = vpack.c.bf16 %v2670_v57, %v2666_v55  ;;  %3253 = vmatpush1.bf16.msra.mxu0 %v5100_v12  ;;  %v5114_v12 = vld [vmem:[%s6729_s3 + $0x1b4] ss:$8 sps:$4 sm:$0xff]  }
 0x1cc   : > { %v4415_v6 = vadd.f32 %v4414_v15, %v6186_v17  ;;  %v4418_v28 = vadd.f32 %v2043_v8, %v6266_v20  ;;  %v2045_v10 = vpop.f32.mrb[23].mxu0  ;;  %3254 = vmatprep.subr.bf16.mxu0 %v5105_v13  ;;  %v5106_v17 = vld [vmem:[%s6729_s3 + $0x190] ss:$8 sps:$4 sm:$0xff]  }
 0x1cd   : > { %v4417_v23 = vadd.f32 %v4416_v16, %v6188_v18  ;;  %v4420_v37 = vadd.f32 %v2045_v10, %v6271_v2  ;;  %3197 = vmatprep.mubr.bf16.mxu0 %v2714_v3  ;;  %v5111_v18 = vld [vmem:[%s6729_s3 + $0x1a4] ss:$8 sps:$4 sm:$0xff]  }
 0x1ce   : > { %v4419_v59 = vadd.f32 %v4418_v28, %v6190_v19  ;;  %3198 = vmatmul.mubr.bf16.gmra.mrb[48].mxu0 %v2713_v63  ;;  %v2673_v32 = vmax.f32 %v4415_v6, 0.0  ;;  %v5115_v6 = vld [vmem:[%s6729_s3 + $0x1c0] ss:$8 sps:$4 sm:$0xff]  }
 0x1cf   : > { %v4421_v30 = vadd.f32 %v4420_v37, %v6192_v21  ;;  %3255 = vmatpush1.bf16.msra.mxu0 %v5103_v5  ;;  %v2674_v39 = vmax.f32 %v4417_v23, 0.0  ;;  %v5120_v23 = vld [vmem:[%s6729_s3 + $0x1d4] ss:$8 sps:$4 sm:$0xff]  }
 0x1d0   : > { %v2677_v33 = vmax.f32 %v4419_v59, 0.0  ;;  %3256 = vmatprep.subr.bf16.mxu0 %v5108_v27 }
 0x1d1   : > { %v2678_v0 = vmax.f32 %v4421_v30, 0.0  ;;  %v2049_v40 = vpop.f32.mrb[24].mxu0 }
 0x1d2   : > { %v4422_v19 = vadd.f32 %v2049_v40, %v6266_v20  ;;  %v2051_v34 = vpop.f32.mrb[25].mxu0  ;;  %v2717_v45 = vpack.c.bf16 %v2677_v33, %v2673_v32  ;;  %v718_v40 = vsub.s32 3, %v6254_v41 }
 0x1d3   : > { %v4424_v21 = vadd.f32 %v2051_v34, %v6271_v2  ;;  %v2053_v38 = vpop.f32.mrb[26].mxu0  ;;  %v2718_v43 = vpack.c.bf16 %v2678_v0, %v2674_v39  ;;  %3257 = vmatpush1.bf16.msra.mxu0 %v5106_v17  ;;  %v5126_v0 = vld [vmem:[%s6729_s3 + $0x1f4] ss:$8 sps:$4 sm:$0xff]  }
 0x1d4   : > { %v4423_v48 = vadd.f32 %v4422_v19, %v6197_v22  ;;  %v4426_v49 = vadd.f32 %v2053_v38, %v6266_v20  ;;  %v2055_v51 = vpop.f32.mrb[27].mxu0  ;;  %3258 = vmatprep.subr.bf16.mxu0 %v5111_v18  ;;  %v5112_v22 = vld [vmem:[%s6729_s3 + $0x1b0] ss:$8 sps:$4 sm:$0xff]  }
 0x1d5   : > { %v4425_v52 = vadd.f32 %v4424_v21, %v6199_v24  ;;  %v4428_v54 = vadd.f32 %v2055_v51, %v6271_v2  ;;  %3207 = vmatprep.mubr.bf16.mxu0 %v2718_v43  ;;  %v5117_v24 = vld [vmem:[%s6729_s3 + $0x1c4] ss:$8 sps:$4 sm:$0xff]   ;;  %v5124_v19 = vld [vmem:[%s6729_s3 + $0x1f0] ss:$8 sps:$4 sm:$0xff]  }
 0x1d6   : > { %v4427_v13 = vadd.f32 %v4426_v49, %v6201_v25  ;;  %3208 = vmatmul.mubr.bf16.gmra.mrb[52].mxu0 %v2717_v45  ;;  %v2681_v57 = vmax.f32 %v4423_v48, 0.0  ;;  %v6502_v45 = vrot.slane %v6260_v42, %v718_v40 }
 0x1d7   : > { %v4429_v55 = vadd.f32 %v4428_v54, %v6203_v26  ;;  %3259 = vmatpush1.bf16.msra.mxu0 %v5109_v46  ;;  %v2682_v15 = vmax.f32 %v4425_v52, 0.0 }
 0x1d8   : > { %v2685_v58 = vmax.f32 %v4427_v13, 0.0  ;;  %3260 = vmatprep.subr.bf16.mxu0 %v5114_v12 }
 0x1d9   : > { %v2686_v61 = vmax.f32 %v4429_v55, 0.0  ;;  %v2059_v63 = vpop.f32.mrb[28].mxu0 }
 0x1da   : > { %v4430_v25 = vadd.f32 %v2059_v63, %v6266_v20  ;;  %v2061_v16 = vpop.f32.mrb[29].mxu0  ;;  %v2721_v8 = vpack.c.bf16 %v2685_v58, %v2681_v57 }
 0x1db   : > { %v4432_v26 = vadd.f32 %v2061_v16, %v6271_v2  ;;  %v2063_v3 = vpop.f32.mrb[30].mxu0  ;;  %v2722_v5 = vpack.c.bf16 %v2686_v61, %v2682_v15  ;;  %3261 = vmatpush1.bf16.msra.mxu0 %v5112_v22 }
 0x1dc   : > { %v4431_v28 = vadd.f32 %v4430_v25, %v6214_v29  ;;  %v4434_v10 = vadd.f32 %v2063_v3, %v6266_v20  ;;  %v2065_v27 = vpop.f32.mrb[31].mxu0  ;;  %3262 = vmatprep.subr.bf16.mxu0 %v5117_v24  ;;  %v5118_v29 = vld [vmem:[%s6729_s3 + $0x1d0] ss:$8 sps:$4 sm:$0xff]  }
 0x1dd   : > { %v4433_v37 = vadd.f32 %v4432_v26, %v6216_v31  ;;  %v4436_v59 = vadd.f32 %v2065_v27, %v6271_v2  ;;  %3217 = vmatprep.mubr.bf16.mxu0 %v2722_v5  ;;  %v5123_v31 = vld [vmem:[%s6729_s3 + $0x1e4] ss:$8 sps:$4 sm:$0xff]  }
 0x1de   : > { %v4435_v30 = vadd.f32 %v4434_v10, %v6218_v35  ;;  %3218 = vmatmul.mubr.bf16.gmra.mrb[56].mxu0 %v2721_v8  ;;  %v2689_v20 = vmax.f32 %v4431_v28, 0.0  ;;  %v5121_v35 = vld [vmem:[%s6729_s3 + $0x1e0] ss:$8 sps:$4 sm:$0xff]  }
 0x1df   : > { %v4437_v17 = vadd.f32 %v4436_v59, %v6223_v36  ;;  %3263 = vmatpush1.bf16.msra.mxu0 %v5115_v6  ;;  %v2690_v33 = vmax.f32 %v4433_v37, 0.0  ;;  %v714_v36 = vsub.s32 2, %v6254_v41 }
 0x1e0   : > { %v2693_v32 = vmax.f32 %v4435_v30, 0.0  ;;  %3264 = vmatprep.subr.bf16.mxu0 %v5120_v23 }
 0x1e1   : > { %v2694_v2 = vmax.f32 %v4437_v17, 0.0  ;;  %v6499_v34 = vrot.slane %v6260_v42, %v714_v36 }
 0x1e2   : > { %v2725_v18 = vpack.c.bf16 %v2693_v32, %v2689_v20 }
 0x1e3   : > { %v2726_v39 = vpack.c.bf16 %v2694_v2, %v2690_v33  ;;  %3265 = vmatpush1.bf16.msra.mxu0 %v5118_v29 }
 0x1e4   : > { %3266 = vmatprep.subr.bf16.mxu0 %v5123_v31 }
 0x1e5   : > { %3227 = vmatprep.mubr.bf16.mxu0 %v2726_v39 }
 0x1e6   : > { %3228 = vmatmul.mubr.bf16.gmra.mrb[60].mxu0 %v2725_v18 }
 0x1e7   : > { %3267 = vmatpush1.bf16.msra.mxu0 %v5121_v35 }
 0x1e8   : > { %3268 = vmatprep.subr.bf16.mxu0 %v5126_v0 }
 0x1eb   : > { %3269 = vmatpush1.bf16.msra.mxu0 %v5124_v19 }
 0x1ec   : > { %4246 = vmatprep.subr.bf16.mxu0 %v6297_v44 }
 0x1ef   : > { %v2554_v21 = vpop.f32.mrb[32].mxu1 }
 0x1f0   : > { %v4438_v38 = vadd.f32 %v2554_v21, %v6499_v34  ;;  %v2556_v43 = vpop.f32.mrb[33].mxu1 }
 0x1f1   : > { %v4439_v46 = vadd.f32 %v2556_v43, %v6502_v45  ;;  %v2558_v48 = vpop.f32.mrb[34].mxu1 }
 0x1f2   : > { %v4440_v49 = vadd.f32 %v2558_v48, %v6499_v34  ;;  %v2560_v51 = vpop.f32.mrb[35].mxu1  ;;  %v2635_v52 = vmax.f32 %v4438_v38, 0.0 }
 0x1f3   : > { %v4441_v12 = vadd.f32 %v2560_v51, %v6502_v45  ;;  %v2636_v13 = vmax.f32 %v4439_v46, 0.0 }
 0x1f4   : > { %v2639_v54 = vmax.f32 %v4440_v49, 0.0 }
 0x1f5   : > { %v2640_v42 = vmax.f32 %v4441_v12, 0.0 }
 0x1f6   : > { %v2699_v55 = vpack.c.bf16 %v2639_v54, %v2635_v52 }
 0x1f7   : > { %v2700_v22 = vpack.c.bf16 %v2640_v42, %v2636_v13  ;;  %v2564_v57 = vpop.f32.mrb[36].mxu1 }
 0x1f8   : > { %v4442_v58 = vadd.f32 %v2564_v57, %v6499_v34  ;;  %v2566_v24 = vpop.f32.mrb[37].mxu1 }
 0x1f9   : > { %v4443_v44 = vadd.f32 %v2566_v24, %v6502_v45  ;;  %v2568_v15 = vpop.f32.mrb[38].mxu1  ;;  %3270 = vmatprep.mubr.bf16.mxu0 %v2700_v22 }
 0x1fa   : > { %v4444_v61 = vadd.f32 %v2568_v15, %v6499_v34  ;;  %v2570_v63 = vpop.f32.mrb[39].mxu1  ;;  %3271 = vmatmul.mubr.bf16.vlgmr.msra.gmra.mrb[32].mxu0 %v2699_v55  ;;  %v2643_v16 = vmax.f32 %v4442_v58, 0.0 }
 0x1fb   : > { %v4445_v25 = vadd.f32 %v2570_v63, %v6502_v45  ;;  %4247 = vmatpush3.bf16.msra.mxu0 %v6306_v47  ;;  %v2644_v26 = vmax.f32 %v4443_v44, 0.0 }
 0x1fc   : > { %v2647_v8 = vmax.f32 %v4444_v61, 0.0  ;;  %4248 = vmatprep.subr.bf16.mxu0 %v6315_v50 }
 0x1fd   : > { %v2648_v3 = vmax.f32 %v4445_v25, 0.0 }
 0x1fe   : > { %v2703_v5 = vpack.c.bf16 %v2647_v8, %v2643_v16 }
 0x1ff   : > { %v2704_v6 = vpack.c.bf16 %v2648_v3, %v2644_v26  ;;  %v2574_v28 = vpop.f32.mrb[40].mxu1  ;;  %4249 = vmatpush3.bf16.msra.mxu0 %v6327_v4 }
 0x200   : > { %v4446_v10 = vadd.f32 %v2574_v28, %v6499_v34  ;;  %v2576_v27 = vpop.f32.mrb[41].mxu1  ;;  %4250 = vmatprep.subr.bf16.mxu0 %v6337_v14 }
 0x201   : > { %v4447_v23 = vadd.f32 %v2576_v27, %v6502_v45  ;;  %v2578_v37 = vpop.f32.mrb[42].mxu1  ;;  %3280 = vmatprep.mubr.bf16.mxu0 %v2704_v6 }
 0x202   : > { %v4448_v47 = vadd.f32 %v2578_v37, %v6499_v34  ;;  %v2580_v59 = vpop.f32.mrb[43].mxu1  ;;  %3281 = vmatmul.mubr.bf16.gmra.mrb[36].mxu0 %v2703_v5  ;;  %v2651_v30 = vmax.f32 %v4446_v10, 0.0 }
 0x203   : > { %v4449_v50 = vadd.f32 %v2580_v59, %v6502_v45  ;;  %4251 = vmatpush3.bf16.msra.mxu0 %v6351_v62  ;;  %v2652_v4 = vmax.f32 %v4447_v23, 0.0 }
 0x204   : > { %v2655_v17 = vmax.f32 %v4448_v47, 0.0  ;;  %4252 = vmatprep.subr.bf16.mxu0 %v6359_v1 }
 0x205   : > { %v2656_v29 = vmax.f32 %v4449_v50, 0.0 }
 0x206   : > { %v2707_v20 = vpack.c.bf16 %v2655_v17, %v2651_v30 }
 0x207   : > { %v2708_v14 = vpack.c.bf16 %v2656_v29, %v2652_v4  ;;  %v2584_v32 = vpop.f32.mrb[44].mxu1  ;;  %4253 = vmatpush3.bf16.msra.mxu0 %v6371_v53 }
 0x208   : > { %v4450_v31 = vadd.f32 %v2584_v32, %v6499_v34  ;;  %v2586_v33 = vpop.f32.mrb[45].mxu1  ;;  %4254 = vmatprep.subr.bf16.mxu0 %v6381_v60 }
 0x209   : > { %v4451_v2 = vadd.f32 %v2586_v33, %v6502_v45  ;;  %v2588_v18 = vpop.f32.mrb[46].mxu1  ;;  %3290 = vmatprep.mubr.bf16.mxu0 %v2708_v14 }
 0x20a   : > { %v4452_v62 = vadd.f32 %v2588_v18, %v6499_v34  ;;  %v2590_v39 = vpop.f32.mrb[47].mxu1  ;;  %3291 = vmatmul.mubr.bf16.gmra.mrb[40].mxu0 %v2707_v20  ;;  %v2659_v35 = vmax.f32 %v4450_v31, 0.0 }
 0x20b   : > { %v4453_v1 = vadd.f32 %v2590_v39, %v6502_v45  ;;  %4255 = vmatpush3.bf16.msra.mxu0 %v6395_v9  ;;  %v2660_v53 = vmax.f32 %v4451_v2, 0.0 }
 0x20c   : > { %v2663_v36 = vmax.f32 %v4452_v62, 0.0  ;;  %4256 = vmatprep.subr.bf16.mxu0 %v6403_v11 }
 0x20d   : > { %v2664_v0 = vmax.f32 %v4453_v1, 0.0 }
 0x20e   : > { %v2711_v40 = vpack.c.bf16 %v2663_v36, %v2659_v35 }
 0x20f   : > { %v2712_v60 = vpack.c.bf16 %v2664_v0, %v2660_v53  ;;  %v2594_v19 = vpop.f32.mrb[48].mxu1  ;;  %v5138_v0 = vld [vmem:[%s6731_s5 + $0x28] sm:$0xff]  }
 0x210   : > { %v4454_v21 = vadd.f32 %v2594_v19, %v6499_v34  ;;  %v2596_v38 = vpop.f32.mrb[49].mxu1  ;;  %4257 = vmatpush3.bf16.msra.mxu0 %v5138_v0  ;;  %4371 = vmatpush3.bf16.msra.mxu1 %v5138_v0  ;;  %v5143_v19 = vld [vmem:[%s6733_s7] sm:$0xff]  }
 0x211   : > { %v4455_v43 = vadd.f32 %v2596_v38, %v6502_v45  ;;  %v2598_v46 = vpop.f32.mrb[50].mxu1  ;;  %3300 = vmatprep.mubr.bf16.mxu0 %v2712_v60  ;;  %v5142_v60 = vld [vmem:[%s6731_s5 + $0x38] sm:$0xff]  }
 0x212   : > { %v4456_v48 = vadd.f32 %v2598_v46, %v6499_v34  ;;  %v2600_v49 = vpop.f32.mrb[51].mxu1  ;;  %3301 = vmatmul.mubr.bf16.gmra.mrb[44].mxu0 %v2711_v40  ;;  %v2667_v51 = vmax.f32 %v4454_v21, 0.0  ;;  %v5141_v40 = vld [vmem:[%s6731_s5 + $0x78] sm:$0xff]   ;;  %v2793_v21 = vld [vmem:[%s6730_s4] sm:$0x3] }
 0x213   : > { %v4457_v9 = vadd.f32 %v2600_v49, %v6502_v45  ;;  %v2668_v12 = vmax.f32 %v4455_v43, 0.0  ;;  %v6570_v38 = vrot.slane %v2793_v21, %v706_v56  ;;  %v6574_v43 = vrot.slane %v2793_v21, %v710_v7 }
 0x214   : > { %v2671_v11 = vmax.f32 %v4456_v48, 0.0 }
 0x215   : > { %v2672_v52 = vmax.f32 %v4457_v9, 0.0 }
 0x216   : > { %v2715_v54 = vpack.c.bf16 %v2671_v11, %v2667_v51 }
 0x217   : > { %v2716_v13 = vpack.c.bf16 %v2672_v52, %v2668_v12  ;;  %v2604_v42 = vpop.f32.mrb[52].mxu1 }
 0x218   : > { %v4458_v55 = vadd.f32 %v2604_v42, %v6499_v34  ;;  %v2606_v22 = vpop.f32.mrb[53].mxu1 }
 0x219   : > { %v4459_v57 = vadd.f32 %v2606_v22, %v6502_v45  ;;  %v2608_v58 = vpop.f32.mrb[54].mxu1  ;;  %3310 = vmatprep.mubr.bf16.mxu0 %v2716_v13 }
 0x21a   : > { %v4460_v24 = vadd.f32 %v2608_v58, %v6499_v34  ;;  %v2610_v44 = vpop.f32.mrb[55].mxu1  ;;  %3311 = vmatmul.mubr.bf16.gmra.mrb[48].mxu0 %v2715_v54  ;;  %v2675_v61 = vmax.f32 %v4458_v55, 0.0 }
 0x21b   : > { %v4461_v15 = vadd.f32 %v2610_v44, %v6502_v45  ;;  %v2676_v25 = vmax.f32 %v4459_v57, 0.0 }
 0x21c   : > { %v2679_v63 = vmax.f32 %v4460_v24, 0.0 }
 0x21d   : > { %v2680_v16 = vmax.f32 %v4461_v15, 0.0 }
 0x21e   : > { %v2719_v8 = vpack.c.bf16 %v2679_v63, %v2675_v61 }
 0x21f   : > { %v2720_v26 = vpack.c.bf16 %v2680_v16, %v2676_v25  ;;  %v2614_v3 = vpop.f32.mrb[56].mxu1 }
 0x220   : > { %v4462_v5 = vadd.f32 %v2614_v3, %v6499_v34  ;;  %v2616_v6 = vpop.f32.mrb[57].mxu1 }
 0x221   : > { %v4463_v28 = vadd.f32 %v2616_v6, %v6502_v45  ;;  %v2618_v10 = vpop.f32.mrb[58].mxu1  ;;  %3320 = vmatprep.mubr.bf16.mxu0 %v2720_v26 }
 0x222   : > { %v4464_v27 = vadd.f32 %v2618_v10, %v6499_v34  ;;  %v2620_v23 = vpop.f32.mrb[59].mxu1  ;;  %3321 = vmatmul.mubr.bf16.gmra.mrb[52].mxu0 %v2719_v8  ;;  %v2683_v47 = vmax.f32 %v4462_v5, 0.0 }
 0x223   : > { %v4465_v37 = vadd.f32 %v2620_v23, %v6502_v45  ;;  %v2684_v50 = vmax.f32 %v4463_v28, 0.0 }
 0x224   : > { %v2687_v59 = vmax.f32 %v4464_v27, 0.0 }
 0x225   : > { %v2688_v30 = vmax.f32 %v4465_v37, 0.0 }
 0x226   : > { %v2723_v17 = vpack.c.bf16 %v2687_v59, %v2683_v47 }
 0x227   : > { %v2724_v4 = vpack.c.bf16 %v2688_v30, %v2684_v50  ;;  %v2624_v29 = vpop.f32.mrb[60].mxu1 }
 0x228   : > { %v4466_v20 = vadd.f32 %v2624_v29, %v6499_v34  ;;  %v2626_v14 = vpop.f32.mrb[61].mxu1 }
 0x229   : > { %v4467_v32 = vadd.f32 %v2626_v14, %v6502_v45  ;;  %v2628_v31 = vpop.f32.mrb[62].mxu1  ;;  %3330 = vmatprep.mubr.bf16.mxu0 %v2724_v4 }
 0x22a   : > { %v4468_v33 = vadd.f32 %v2628_v31, %v6499_v34  ;;  %v2630_v2 = vpop.f32.mrb[63].mxu1  ;;  %3331 = vmatmul.mubr.bf16.gmra.mrb[56].mxu0 %v2723_v17  ;;  %v2691_v62 = vmax.f32 %v4466_v20, 0.0  ;;  %v5139_v34 = vld [vmem:[%s6731_s5 + $0x70] sm:$0xff]   ;;  %v5144_v31 = vld [vmem:[%s6733_s7 + $0x8] sm:$0xff]  }
 0x22b   : > { %v4469_v18 = vadd.f32 %v2630_v2, %v6502_v45  ;;  %v2692_v1 = vmax.f32 %v4467_v32, 0.0  ;;  %v5140_v45 = vld [vmem:[%s6731_s5 + $0x30] sm:$0xff]   ;;  %4258 = vmatprep.subr.bf16.mxu0 %v5139_v34  ;;  %4364 = vmatprep.subr.bf16.mxu1 %v5139_v34 }
 0x22c   : > { %v2695_v39 = vmax.f32 %v4468_v33, 0.0  ;;  %4259 = vmatpush3.bf16.msra.mxu0 %v5140_v45  ;;  %4372 = vmatpush3.bf16.msra.mxu1 %v5140_v45 }
 0x22d   : > { %v2696_v35 = vmax.f32 %v4469_v18, 0.0  ;;  %4260 = vmatprep.subr.bf16.mxu0 %v5141_v40  ;;  %4365 = vmatprep.subr.bf16.mxu1 %v5141_v40 }
 0x22e   : > { %v2727_v36 = vpack.c.bf16 %v2695_v39, %v2691_v62 }
 0x22f   : > { %v2728_v53 = vpack.c.bf16 %v2696_v35, %v2692_v1 }
 0x230   : > { %4261 = vmatpush3.bf16.msra.mxu0 %v5142_v60  ;;  %4373 = vmatpush3.bf16.msra.mxu1 %v5142_v60 }
 0x231   : > { %3340 = vmatprep.mubr.bf16.mxu0 %v2728_v53  ;;  %4326 = vmatprep.subr.bf16.mxu1 %v5143_v19 }
 0x232   : > { %3341 = vmatmul.mubr.bf16.gmra.mrb[60].mxu0 %v2727_v36  ;;  %v5145_v36 = vld [vmem:[%s6733_s7 + $0x10] sm:$0xff]  }
 0x2cd   : > { %v3272_v46 = vpop.f32.mrb[32].mxu0 }
 0x2ce   : > { %v4470_v48 = vadd.f32 %v3272_v46, %v6570_v38  ;;  %v3274_v49 = vpop.f32.mrb[33].mxu0 }
 0x2cf   : > { %v4471_v9 = vadd.f32 %v3274_v49, %v6574_v43  ;;  %v3276_v51 = vpop.f32.mrb[34].mxu0 }
 0x2d0   : > { %v4472_v11 = vadd.f32 %v3276_v51, %v6570_v38  ;;  %v3278_v12 = vpop.f32.mrb[35].mxu0  ;;  %v3351_v54 = vmax.f32 %v4470_v48, 0.0 }
 0x2d1   : > { %v4473_v52 = vadd.f32 %v3278_v12, %v6574_v43  ;;  %v3352_v56 = vmax.f32 %v4471_v9, 0.0 }
 0x2d2   : > { %v3353_v13 = vmax.f32 %v4472_v11, 0.0 }
 0x2d3   : > { %v3354_v42 = vmax.f32 %v4473_v52, 0.0 }
 0x2d4   : > { %v3383_v55 = vpack.c.bf16 %v3353_v13, %v3351_v54 }
 0x2d5   : > { %v3384_v41 = vpack.c.bf16 %v3354_v42, %v3352_v56  ;;  %v3282_v7 = vpop.f32.mrb[36].mxu0 }
 0x2d6   : > { %v4474_v22 = vadd.f32 %v3282_v7, %v6570_v38  ;;  %v3284_v57 = vpop.f32.mrb[37].mxu0 }
 0x2d7   : > { %v4475_v58 = vadd.f32 %v3284_v57, %v6574_v43  ;;  %v3286_v24 = vpop.f32.mrb[38].mxu0  ;;  %3566 = vmatprep.mubr.bf16.mxu0 %v3384_v41 }
 0x2d8   : > { %v4476_v44 = vadd.f32 %v3286_v24, %v6570_v38  ;;  %v3288_v15 = vpop.f32.mrb[39].mxu0  ;;  %3567 = vmatmul.mubr.bf16.vlgmr.msra.gmra.mrb[64].mxu0 %v3383_v55  ;;  %v3355_v63 = vmax.f32 %v4474_v22, 0.0 }
 0x2d9   : > { %v4477_v61 = vadd.f32 %v3288_v15, %v6574_v43  ;;  %v3356_v16 = vmax.f32 %v4475_v58, 0.0 }
 0x2da   : > { %v3357_v25 = vmax.f32 %v4476_v44, 0.0 }
 0x2db   : > { %v3358_v8 = vmax.f32 %v4477_v61, 0.0 }
 0x2dc   : > { %v3385_v26 = vpack.c.bf16 %v3357_v25, %v3355_v63 }
 0x2dd   : > { %v3386_v3 = vpack.c.bf16 %v3358_v8, %v3356_v16  ;;  %v3292_v5 = vpop.f32.mrb[40].mxu0 }
 0x2de   : > { %v4478_v6 = vadd.f32 %v3292_v5, %v6570_v38  ;;  %v3294_v28 = vpop.f32.mrb[41].mxu0 }
 0x2df   : > { %v4479_v10 = vadd.f32 %v3294_v28, %v6574_v43  ;;  %v3296_v27 = vpop.f32.mrb[42].mxu0  ;;  %3574 = vmatprep.mubr.bf16.mxu0 %v3386_v3 }
 0x2e0   : > { %v4480_v23 = vadd.f32 %v3296_v27, %v6570_v38  ;;  %v3298_v37 = vpop.f32.mrb[43].mxu0  ;;  %3575 = vmatmul.mubr.bf16.gmra.mrb[68].mxu0 %v3385_v26  ;;  %v3359_v59 = vmax.f32 %v4478_v6, 0.0 }
 0x2e1   : > { %v4481_v47 = vadd.f32 %v3298_v37, %v6574_v43  ;;  %v3360_v30 = vmax.f32 %v4479_v10, 0.0 }
 0x2e2   : > { %v3361_v50 = vmax.f32 %v4480_v23, 0.0 }
 0x2e3   : > { %v3362_v17 = vmax.f32 %v4481_v47, 0.0 }
 0x2e4   : > { %v3387_v4 = vpack.c.bf16 %v3361_v50, %v3359_v59 }
 0x2e5   : > { %v3388_v29 = vpack.c.bf16 %v3362_v17, %v3360_v30  ;;  %v3302_v20 = vpop.f32.mrb[44].mxu0 }
 0x2e6   : > { %v4482_v14 = vadd.f32 %v3302_v20, %v6570_v38  ;;  %v3304_v32 = vpop.f32.mrb[45].mxu0 }
 0x2e7   : > { %v4483_v33 = vadd.f32 %v3304_v32, %v6574_v43  ;;  %v3306_v2 = vpop.f32.mrb[46].mxu0  ;;  %3582 = vmatprep.mubr.bf16.mxu1 %v3388_v29 }
 0x2e8   : > { %v4484_v18 = vadd.f32 %v3306_v2, %v6570_v38  ;;  %v3308_v62 = vpop.f32.mrb[47].mxu0  ;;  %3583 = vmatmul.mubr.bf16.vlgmr.msra.gmra.mrb[64].mxu1 %v3387_v4  ;;  %v3363_v1 = vmax.f32 %v4482_v14, 0.0 }
 0x2e9   : > { %v4485_v39 = vadd.f32 %v3308_v62, %v6574_v43  ;;  %4327 = vmatpush3.bf16.msra.mxu1 %v5143_v19  ;;  %v3364_v53 = vmax.f32 %v4483_v33, 0.0 }
 0x2ea   : > { %v3365_v35 = vmax.f32 %v4484_v18, 0.0  ;;  %4328 = vmatprep.subr.bf16.mxu1 %v5144_v31 }
 0x2eb   : > { %v3366_v0 = vmax.f32 %v4485_v39, 0.0 }
 0x2ec   : > { %v3389_v34 = vpack.c.bf16 %v3365_v35, %v3363_v1  ;;  %v5146_v35 = vld [vmem:[%s6733_s7 + $0x18] sm:$0xff]  }
 0x2ed   : > { %v3390_v45 = vpack.c.bf16 %v3366_v0, %v3364_v53  ;;  %v3312_v40 = vpop.f32.mrb[48].mxu0  ;;  %4329 = vmatpush3.bf16.msra.mxu1 %v5144_v31  ;;  %v5150_v53 = vld [vmem:[%s6733_s7 + $0x38] sm:$0xff]  }
 0x2ee   : > { %v4486_v60 = vadd.f32 %v3312_v40, %v6570_v38  ;;  %v3314_v21 = vpop.f32.mrb[49].mxu0  ;;  %4330 = vmatprep.subr.bf16.mxu1 %v5145_v36 }
 0x2ef   : > { %v4487_v46 = vadd.f32 %v3314_v21, %v6574_v43  ;;  %v3316_v19 = vpop.f32.mrb[50].mxu0  ;;  %3590 = vmatprep.mubr.bf16.mxu1 %v3390_v45 }
 0x2f0   : > { %v4488_v48 = vadd.f32 %v3316_v19, %v6570_v38  ;;  %v3318_v49 = vpop.f32.mrb[51].mxu0  ;;  %3591 = vmatmul.mubr.bf16.gmra.mrb[68].mxu1 %v3389_v34  ;;  %v3367_v51 = vmax.f32 %v4486_v60, 0.0  ;;  %v6632_v34 = vld [vmem:[%s6732_s6] ss:$0 sm:$0xff] }
 0x2f1   : > { %v4489_v9 = vadd.f32 %v3318_v49, %v6574_v43  ;;  %4331 = vmatpush3.bf16.msra.mxu1 %v5145_v36  ;;  %v3368_v12 = vmax.f32 %v4487_v46, 0.0  ;;  %v5149_v36 = vld [vmem:[%s6733_s7 + $0x30] sm:$0xff]  }
 0x2f2   : > { %v3369_v11 = vmax.f32 %v4488_v48, 0.0  ;;  %4332 = vmatprep.subr.bf16.mxu1 %v5146_v35 }
 0x2f3   : > { %v3370_v52 = vmax.f32 %v4489_v9, 0.0 }
 0x2f4   : > { %v3391_v54 = vpack.c.bf16 %v3369_v11, %v3367_v51 }
 0x2f5   : > { %v3392_v13 = vpack.c.bf16 %v3370_v52, %v3368_v12  ;;  %v3322_v56 = vpop.f32.mrb[52].mxu0  ;;  %4333 = vmatpush3.bf16.msra.mxu1 %v5146_v35 }
 0x2f6   : > { %v4490_v42 = vadd.f32 %v3322_v56, %v6570_v38  ;;  %v3324_v55 = vpop.f32.mrb[53].mxu0 }
 0x2f7   : > { %v4491_v41 = vadd.f32 %v3324_v55, %v6574_v43  ;;  %v3326_v7 = vpop.f32.mrb[54].mxu0  ;;  %3598 = vmatprep.mubr.bf16.mxu1 %v3392_v13 }
 0x2f8   : > { %v4492_v22 = vadd.f32 %v3326_v7, %v6570_v38  ;;  %v3328_v57 = vpop.f32.mrb[55].mxu0  ;;  %3599 = vmatmul.mubr.bf16.gmra.mrb[72].mxu1 %v3391_v54  ;;  %v3371_v24 = vmax.f32 %v4490_v42, 0.0 }
 0x2f9   : > { %v4493_v58 = vadd.f32 %v3328_v57, %v6574_v43  ;;  %v3372_v15 = vmax.f32 %v4491_v41, 0.0 }
 0x2fa   : > { %v3373_v44 = vmax.f32 %v4492_v22, 0.0 }
 0x2fb   : > { %v3374_v61 = vmax.f32 %v4493_v58, 0.0 }
 0x2fc   : > { %v3393_v63 = vpack.c.bf16 %v3373_v44, %v3371_v24 }
 0x2fd   : > { %v3394_v25 = vpack.c.bf16 %v3374_v61, %v3372_v15  ;;  %v3332_v16 = vpop.f32.mrb[56].mxu0 }
 0x2fe   : > { %v4494_v8 = vadd.f32 %v3332_v16, %v6570_v38  ;;  %v3334_v26 = vpop.f32.mrb[57].mxu0 }
 0x2ff   : > { %v4495_v3 = vadd.f32 %v3334_v26, %v6574_v43  ;;  %v3336_v5 = vpop.f32.mrb[58].mxu0  ;;  %3606 = vmatprep.mubr.bf16.mxu1 %v3394_v25 }
 0x300   : > { %v4496_v6 = vadd.f32 %v3336_v5, %v6570_v38  ;;  %v3338_v28 = vpop.f32.mrb[59].mxu0  ;;  %3607 = vmatmul.mubr.bf16.gmra.mrb[76].mxu1 %v3393_v63  ;;  %v3375_v27 = vmax.f32 %v4494_v8, 0.0 }
 0x301   : > { %v4497_v10 = vadd.f32 %v3338_v28, %v6574_v43  ;;  %v3376_v37 = vmax.f32 %v4495_v3, 0.0 }
 0x302   : > { %v3377_v23 = vmax.f32 %v4496_v6, 0.0 }
 0x303   : > { %v3378_v47 = vmax.f32 %v4497_v10, 0.0 }
 0x304   : > { %v3395_v59 = vpack.c.bf16 %v3377_v23, %v3375_v27 }
 0x305   : > { %v3396_v50 = vpack.c.bf16 %v3378_v47, %v3376_v37  ;;  %v3342_v30 = vpop.f32.mrb[60].mxu0 }
 0x306   : > { %v4498_v17 = vadd.f32 %v3342_v30, %v6570_v38  ;;  %v3344_v4 = vpop.f32.mrb[61].mxu0 }
 0x307   : > { %v4499_v29 = vadd.f32 %v3344_v4, %v6574_v43  ;;  %v3346_v20 = vpop.f32.mrb[62].mxu0  ;;  %3614 = vmatprep.mubr.bf16.mxu1 %v3396_v50 }
 0x308   : > { %v4500_v14 = vadd.f32 %v3346_v20, %v6570_v38  ;;  %v3348_v32 = vpop.f32.mrb[63].mxu0  ;;  %3615 = vmatmul.mubr.bf16.gmra.mrb[80].mxu1 %v3395_v59  ;;  %v3379_v33 = vmax.f32 %v4498_v17, 0.0  ;;  %v5147_v38 = vld [vmem:[%s6733_s7 + $0x20] sm:$0xff]  }
 0x309   : > { %v4501_v31 = vadd.f32 %v3348_v32, %v6574_v43  ;;  %v3380_v18 = vmax.f32 %v4499_v29, 0.0  ;;  %4334 = vmatprep.subr.bf16.mxu1 %v5147_v38  ;;  %v5148_v43 = vld [vmem:[%s6733_s7 + $0x28] sm:$0xff]  }
 0x30a   : > { %v3381_v2 = vmax.f32 %v4500_v14, 0.0  ;;  %4335 = vmatpush3.bf16.msra.mxu1 %v5147_v38 }
 0x30b   : > { %v3382_v62 = vmax.f32 %v4501_v31, 0.0  ;;  %4336 = vmatprep.subr.bf16.mxu1 %v5148_v43 }
 0x30c   : > { %v3397_v39 = vpack.c.bf16 %v3381_v2, %v3379_v33 }
 0x30d   : > { %v3398_v1 = vpack.c.bf16 %v3382_v62, %v3380_v18 }
 0x30e   : > { %4337 = vmatpush3.bf16.msra.mxu1 %v5148_v43 }
 0x30f   : > { %3622 = vmatprep.mubr.bf16.mxu1 %v3398_v1  ;;  %4338 = vmatprep.subr.bf16.mxu1 %v5149_v36 }
 0x310   : > { %3623 = vmatmul.mubr.bf16.gmra.mrb[84].mxu1 %v3397_v39 }
 0x312   : > { %4339 = vmatpush3.bf16.msra.mxu1 %v5149_v36 }
 0x313   : > { %4340 = vmatprep.subr.bf16.mxu1 %v5150_v53 }
 0x316   : > { %4341 = vmatpush3.bf16.msra.mxu1 %v5150_v53 }
 0x3ab   : > { %v4262_v0 = vpop.f32.mrb[64].mxu0 }
 0x3ac   : > { %v4263_v45 = vpop.f32.mrb[65].mxu0 }
 0x3ad   : > { %v4264_v40 = vadd.f32 %v4263_v45, %v4262_v0  ;;  %v4265_v60 = vpop.f32.mrb[66].mxu0 }
 0x3ae   : > { %v4266_v21 = vpop.f32.mrb[67].mxu0 }
 0x3af   : > { %v3569_v46 = vadd.f32 %v4264_v40, %v6632_v34  ;;  %v4267_v19 = vadd.f32 %v4266_v21, %v4265_v60 }
 0x3b1   : > { %v3572_v48 = vadd.f32 %v4267_v19, %v6632_v34  ;;  %v3631_v49 = vmax.f32 %v3569_v46, 0.0 }
 0x3b3   : > { %v3632_v9 = vmax.f32 %v3572_v48, 0.0  ;;  %v4268_v51 = vpop.f32.mrb[68].mxu0 }
 0x3b4   : > { %v4269_v11 = vpop.f32.mrb[69].mxu0 }
 0x3b5   : > { %v4270_v12 = vadd.f32 %v4269_v11, %v4268_v51  ;;  %v4271_v52 = vpop.f32.mrb[70].mxu0  ;;  %v3647_v54 = vpack.c.bf16 %v3632_v9, %v3631_v49 }
 0x3b6   : > { %v4272_v13 = vpop.f32.mrb[71].mxu0 }
 0x3b7   : > { %v3577_v56 = vadd.f32 %v4270_v12, %v6632_v34  ;;  %v4273_v42 = vadd.f32 %v4272_v13, %v4271_v52  ;;  %4342 = vmatprep.mubr.bf16.mxu1 %v3647_v54 }
 0x3b9   : > { %v3580_v55 = vadd.f32 %v4273_v42, %v6632_v34  ;;  %v3633_v41 = vmax.f32 %v3577_v56, 0.0 }
 0x3bb   : > { %v3634_v7 = vmax.f32 %v3580_v55, 0.0  ;;  %v4274_v22 = vpop.f32.mrb[64].mxu1 }
 0x3bc   : > { %v4275_v57 = vpop.f32.mrb[65].mxu1 }
 0x3bd   : > { %v3648_v58 = vpack.c.bf16 %v3634_v7, %v3633_v41  ;;  %v4276_v24 = vadd.f32 %v4275_v57, %v4274_v22  ;;  %v4277_v44 = vpop.f32.mrb[66].mxu1 }
 0x3be   : > { %v4278_v15 = vpop.f32.mrb[67].mxu1 }
 0x3bf   : > { %v3585_v61 = vadd.f32 %v4276_v24, %v6632_v34  ;;  %v4279_v63 = vadd.f32 %v4278_v15, %v4277_v44  ;;  %4343 = vmatmul.mubr.bf16.vlgmr.msra.gmra.mrb[88].mxu1 %v3648_v58  ;;  %v4231_v44 = vld [vmem:[%s6734_s8] ss:$0 sm:$0xff] }
 0x3c1   : > { %v3588_v25 = vadd.f32 %v4279_v63, %v6632_v34  ;;  %v3635_v16 = vmax.f32 %v3585_v61, 0.0 }
 0x3c3   : > { %v3636_v8 = vmax.f32 %v3588_v25, 0.0  ;;  %v4280_v26 = vpop.f32.mrb[68].mxu1 }
 0x3c4   : > { %v4281_v3 = vpop.f32.mrb[69].mxu1 }
 0x3c5   : > { %v4282_v5 = vadd.f32 %v4281_v3, %v4280_v26  ;;  %v4283_v6 = vpop.f32.mrb[70].mxu1  ;;  %v3649_v28 = vpack.c.bf16 %v3636_v8, %v3635_v16 }
 0x3c6   : > { %v4284_v10 = vpop.f32.mrb[71].mxu1 }
 0x3c7   : > { %v3593_v27 = vadd.f32 %v4282_v5, %v6632_v34  ;;  %v4285_v23 = vadd.f32 %v4284_v10, %v4283_v6  ;;  %4346 = vmatprep.mubr.bf16.mxu1 %v3649_v28 }
 0x3c9   : > { %v3596_v37 = vadd.f32 %v4285_v23, %v6632_v34  ;;  %v3637_v47 = vmax.f32 %v3593_v27, 0.0 }
 0x3cb   : > { %v3638_v59 = vmax.f32 %v3596_v37, 0.0  ;;  %v4286_v50 = vpop.f32.mrb[72].mxu1 }
 0x3cc   : > { %v4287_v30 = vpop.f32.mrb[73].mxu1 }
 0x3cd   : > { %v4288_v17 = vadd.f32 %v4287_v30, %v4286_v50  ;;  %v4289_v4 = vpop.f32.mrb[74].mxu1  ;;  %v3650_v29 = vpack.c.bf16 %v3638_v59, %v3637_v47 }
 0x3ce   : > { %v4290_v20 = vpop.f32.mrb[75].mxu1 }
 0x3cf   : > { %v3601_v14 = vadd.f32 %v4288_v17, %v6632_v34  ;;  %v4291_v32 = vadd.f32 %v4290_v20, %v4289_v4  ;;  %4347 = vmatmul.mubr.bf16.gmra.mrb[92].mxu1 %v3650_v29 }
 0x3d1   : > { %v3604_v31 = vadd.f32 %v4291_v32, %v6632_v34  ;;  %v3639_v33 = vmax.f32 %v3601_v14, 0.0 }
 0x3d3   : > { %v3640_v2 = vmax.f32 %v3604_v31, 0.0  ;;  %v4292_v18 = vpop.f32.mrb[76].mxu1 }
 0x3d4   : > { %v4293_v62 = vpop.f32.mrb[77].mxu1 }
 0x3d5   : > { %v4294_v39 = vadd.f32 %v4293_v62, %v4292_v18  ;;  %v4295_v1 = vpop.f32.mrb[78].mxu1  ;;  %v3651_v35 = vpack.c.bf16 %v3640_v2, %v3639_v33 }
 0x3d6   : > { %v4296_v38 = vpop.f32.mrb[79].mxu1 }
 0x3d7   : > { %v3609_v43 = vadd.f32 %v4294_v39, %v6632_v34  ;;  %v4297_v36 = vadd.f32 %v4296_v38, %v4295_v1  ;;  %4350 = vmatprep.mubr.bf16.mxu1 %v3651_v35 }
 0x3d9   : > { %v3612_v53 = vadd.f32 %v4297_v36, %v6632_v34  ;;  %v3641_v0 = vmax.f32 %v3609_v43, 0.0 }
 0x3db   : > { %v3642_v45 = vmax.f32 %v3612_v53, 0.0  ;;  %v4298_v40 = vpop.f32.mrb[80].mxu1 }
 0x3dc   : > { %v4299_v60 = vpop.f32.mrb[81].mxu1 }
 0x3dd   : > { %v4300_v21 = vadd.f32 %v4299_v60, %v4298_v40  ;;  %v4301_v46 = vpop.f32.mrb[82].mxu1  ;;  %v3652_v19 = vpack.c.bf16 %v3642_v45, %v3641_v0 }
 0x3de   : > { %v4302_v48 = vpop.f32.mrb[83].mxu1 }
 0x3df   : > { %v3617_v49 = vadd.f32 %v4300_v21, %v6632_v34  ;;  %v4303_v9 = vadd.f32 %v4302_v48, %v4301_v46  ;;  %4351 = vmatmul.mubr.bf16.gmra.mrb[96].mxu1 %v3652_v19 }
 0x3e1   : > { %v3620_v51 = vadd.f32 %v4303_v9, %v6632_v34  ;;  %v3643_v11 = vmax.f32 %v3617_v49, 0.0 }
 0x3e3   : > { %v3644_v12 = vmax.f32 %v3620_v51, 0.0  ;;  %v4304_v52 = vpop.f32.mrb[84].mxu1 }
 0x3e4   : > { %v4305_v54 = vpop.f32.mrb[85].mxu1 }
 0x3e5   : > { %v4306_v13 = vadd.f32 %v4305_v54, %v4304_v52  ;;  %v4307_v56 = vpop.f32.mrb[86].mxu1  ;;  %v3653_v42 = vpack.c.bf16 %v3644_v12, %v3643_v11 }
 0x3e6   : > { %v4308_v55 = vpop.f32.mrb[87].mxu1 }
 0x3e7   : > { %v3625_v41 = vadd.f32 %v4306_v13, %v6632_v34  ;;  %v4309_v7 = vadd.f32 %v4308_v55, %v4307_v56  ;;  %4354 = vmatprep.mubr.bf16.mxu1 %v3653_v42 }
 0x3e9   : > { %v3628_v22 = vadd.f32 %v4309_v7, %v6632_v34  ;;  %v3645_v57 = vmax.f32 %v3625_v41, 0.0 }
 0x3eb   : > { %v3646_v58 = vmax.f32 %v3628_v22, 0.0 }
 0x3ed   : > { %v3654_v24 = vpack.c.bf16 %v3646_v58, %v3645_v57 }
 0x3ef   : > { %4355 = vmatmul.mubr.bf16.gmra.mrb[100].mxu1 %v3654_v24 }
 0x492   : > { %v4344_v15 = vpop.f32.mrb[88].mxu1 }
 0x493   : > { %v3769_v61 = vadd.f32 %v4344_v15, %v4231_v44  ;;  %v3760_v63 = vpop.f32.mrb[89].mxu1 }
 0x494   : > { %v3761_v25 = vadd.f32 %v4231_v44, %v3760_v63  ;;  %v4345_v16 = vpop.f32.mrb[90].mxu1 }
 0x495   : > { %v3825_v8 = vmax.f32 %v3769_v61, 0.0  ;;  %v3772_v26 = vadd.f32 %v4345_v16, %v4231_v44  ;;  %v3763_v3 = vpop.f32.mrb[91].mxu1 }
 0x496   : > { %v3823_v34 = vmax.f32 %v3761_v25, 0.0  ;;  %v3764_v5 = vadd.f32 %v4231_v44, %v3763_v3 }
 0x497   : > { %3841 = vst [vmem:[%s6656_s14 + $0x10] sm:$0xff] %v3825_v8  ;;  %v3826_v6 = vmax.f32 %v3772_v26, 0.0 }
 0x498   : > { %3839 = vst [vmem:[%s6656_s14] sm:$0xff] %v3823_v34  ;;  %v3824_v28 = vmax.f32 %v3764_v5, 0.0 }
 0x499   : > { %3842 = vst [vmem:[%s6656_s14 + $0x18] sm:$0xff] %v3826_v6 }
 0x49a   : > { %3840 = vst [vmem:[%s6656_s14 + $0x8] sm:$0xff] %v3824_v28 }
 0x4a2   : > { %v4348_v10 = vpop.f32.mrb[92].mxu1 }
 0x4a3   : > { %v3785_v27 = vadd.f32 %v4348_v10, %v4231_v44  ;;  %v3776_v23 = vpop.f32.mrb[93].mxu1 }
 0x4a4   : > { %v3777_v37 = vadd.f32 %v4231_v44, %v3776_v23  ;;  %v4349_v47 = vpop.f32.mrb[94].mxu1 }
 0x4a5   : > { %v3829_v59 = vmax.f32 %v3785_v27, 0.0  ;;  %v3788_v50 = vadd.f32 %v4349_v47, %v4231_v44  ;;  %v3779_v30 = vpop.f32.mrb[95].mxu1 }
 0x4a6   : > { %v3827_v17 = vmax.f32 %v3777_v37, 0.0  ;;  %v3780_v4 = vadd.f32 %v4231_v44, %v3779_v30 }
 0x4a7   : > { %3845 = vst [vmem:[%s6656_s14 + $0x30] sm:$0xff] %v3829_v59  ;;  %v3830_v29 = vmax.f32 %v3788_v50, 0.0 }
 0x4a8   : > { %3843 = vst [vmem:[%s6656_s14 + $0x20] sm:$0xff] %v3827_v17  ;;  %v3828_v20 = vmax.f32 %v3780_v4, 0.0 }
 0x4a9   : > { %3846 = vst [vmem:[%s6656_s14 + $0x38] sm:$0xff] %v3830_v29 }
 0x4aa   : > { %3844 = vst [vmem:[%s6656_s14 + $0x28] sm:$0xff] %v3828_v20 }
 0x4b2   : > { %v4352_v14 = vpop.f32.mrb[96].mxu1 }
 0x4b3   : > { %v3801_v32 = vadd.f32 %v4352_v14, %v4231_v44  ;;  %v3792_v31 = vpop.f32.mrb[97].mxu1 }
 0x4b4   : > { %v3793_v33 = vadd.f32 %v4231_v44, %v3792_v31  ;;  %v4353_v2 = vpop.f32.mrb[98].mxu1 }
 0x4b5   : > { %v3833_v18 = vmax.f32 %v3801_v32, 0.0  ;;  %v3804_v62 = vadd.f32 %v4353_v2, %v4231_v44  ;;  %v3795_v39 = vpop.f32.mrb[99].mxu1 }
 0x4b6   : > { %v3831_v1 = vmax.f32 %v3793_v33, 0.0  ;;  %v3796_v35 = vadd.f32 %v4231_v44, %v3795_v39 }
 0x4b7   : > { %3849 = vst [vmem:[%s6656_s14 + $0x50] sm:$0xff] %v3833_v18  ;;  %v3834_v38 = vmax.f32 %v3804_v62, 0.0 }
 0x4b8   : > { %3847 = vst [vmem:[%s6656_s14 + $0x40] sm:$0xff] %v3831_v1  ;;  %v3832_v43 = vmax.f32 %v3796_v35, 0.0 }
 0x4b9   : > { %3850 = vst [vmem:[%s6656_s14 + $0x58] sm:$0xff] %v3834_v38 }
 0x4ba   : > { %3848 = vst [vmem:[%s6656_s14 + $0x48] sm:$0xff] %v3832_v43 }
 0x4c2   : > { %v4356_v36 = vpop.f32.mrb[100].mxu1 }
 0x4c3   : > { %v3817_v53 = vadd.f32 %v4356_v36, %v4231_v44  ;;  %v3808_v0 = vpop.f32.mrb[101].mxu1 }
 0x4c4   : > { %v3809_v45 = vadd.f32 %v4231_v44, %v3808_v0  ;;  %v4357_v40 = vpop.f32.mrb[102].mxu1 }
 0x4c5   : > { %v3837_v60 = vmax.f32 %v3817_v53, 0.0  ;;  %v3820_v21 = vadd.f32 %v4357_v40, %v4231_v44  ;;  %v3811_v46 = vpop.f32.mrb[103].mxu1 }
 0x4c6   : > { %v3835_v19 = vmax.f32 %v3809_v45, 0.0  ;;  %v3812_v48 = vadd.f32 %v4231_v44, %v3811_v46 }
 0x4c7   : > { %3853 = vst [vmem:[%s6656_s14 + $0x70] sm:$0xff] %v3837_v60  ;;  %v3838_v49 = vmax.f32 %v3820_v21, 0.0 }
 0x4c8   : > { %3851 = vst [vmem:[%s6656_s14 + $0x60] sm:$0xff] %v3835_v19  ;;  %v3836_v9 = vmax.f32 %v3812_v48, 0.0 }
 0x4c9   : > { %3854 = vst [vmem:[%s6656_s14 + $0x78] sm:$0xff] %v3838_v49 }
 0x4ca   : > { %3852 = vst [vmem:[%s6656_s14 + $0x68] sm:$0xff] %v3836_v9 }
 0x4cb   : > { %5164 = shalt.err (!%p5161_p3)
}
 0x4cc   : > { %s5165_s27 = scalar_lea.hbm %s6676_s24, 2048  ;;  %s5169_s16 = scalar_lea.hbm %s6735_s9, 8192 }
 0x4cd   : > { %p5166_p4 = scmp.ne.s32.totalorder %s6676_s24, %s5165_s27  ;;  %p5170_p9 = scmp.lt.u32.totalorder %s6676_s24, %s6735_s9 }
 0x4ce   : > { %p5171_p10 = scmp.lt.u32.totalorder %s5169_s16, %s5165_s27  ;;  %p5173_p12 = scmp.lt.u32.totalorder %s5165_s27, %s6676_s24 }
 0x4cf   : > { %p5167_p7 = pnand %p5166_p4, %p5307_p5 }
 0x4d0   : > { %p5172_p11 = por %p5171_p10, %p5170_p9 }
 0x4d1   : > { %p5168_p8 = pneg %p5167_p7 }
 0x4d2   : > { %p5174_p13 = por %p5173_p12, %p5172_p11 }
 0x4d4   : > { %p5175_p0 = pnand %p5174_p13, %p5168_p8 }
 0x4d6   : > { %5178 = shalt.err (!%p5175_p0)
}
 0x4d7   : > { %s5217_s25 = smov 128   ;;  %s5218_s26 = smov 8  }
 0x4d8   : > { %4695 = dma.vmem_to_hbm [thread:$0]  (%p5307_p5), %s6678_s21, 2048, %s6676_s24, %s6685_s13, %s5217_s25, %s5217_s25, %s5218_s26  }
 0x4d9 PF: > { %p4701_p1 = scmp.ge.s32.totalorder %s5213_s12, 2  ;;  %s3884_s28 = sand.u32 1, %s5201_s30  }
 0x4da   : > { %s3885_s17 = scalar_lea.sflag [#allocation3], %s3884_s28 }
 0x4db   : > { %p4698_p2 = pnand %p4701_p1, %p5311_p6 }
 0x4dd   : > { %5196 = dma.done.wait (!%p4698_p2), %s3885_s17, 2048  }
 0x4de   : > { %5198 = vsyncadd (!%p4698_p2), %s3885_s17, 4294965248  ;;  %p19_p3 = scmp.ge.s32.totalorder %s5294_s15, 6   ;;  %s6738_s30 = smov %s5205_s10 }
 0x4df   : > { %s6739_s10 = smov %s5209_s11  ;;  %s6740_s11 = smov %s5305_s18 }
 0x4e0   : > { %s6741_s12 = smov %s5294_s15  ;;  %21 = sbr.rel (!%p19_p3) target bundleno = 3 (0x3), region = 91 }
 0x4e7   :  { %3890 = vsyncpa [#allocation3], 1 }
 0x4e8   :  { %3892 = vsyncpa [#allocation3 + $0x1], 1 }

</bundles_post_ra>
